<compile_context>
chip_gen: v7x
topology: tpu7x:2x2x1
jax: 0.10.0
libtpu: 0.0.40
codegen_flags: <defaults>
</compile_context>

<pallas_src>
import jax
import jax.numpy as jnp
import numpy as np
from jax import lax
from jax.experimental import pallas as pl
from jax.experimental.pallas import tpu as pltpu

IMG_C, IMG_H, IMG_W = 3, 16, 16
D_IMG = IMG_C * IMG_H * IMG_W      # 768 flattened image pixels
IMG_FEAT = 512                     # resnet18 penultimate feature dim
HIDDEN = 768                       # distilbert hidden_size
TXT_FEAT = 256                     # text_fc output dim
NUM_CLASSES = 6                    # garbage classes
NC_PAD = 128                       # lane-dense padded logits width
SEQ = 8
VOCAB = 128
SUBLANE = 8                        # f32 sublane granularity


# --------------------------------------------------------------------------
# One fused kernel: embedding "gather" (one-hot matmul) + mask pooling +
# text_fc + image projection + concat-classifier.
# The concat is realized by splitting the classifier weight into its image
# (512-row) and text (256-row) halves: cat([img, txt]) @ W == img@W_i + txt@W_t.
# --------------------------------------------------------------------------
def fused_kernel(ids_ref, mask_ref, emb_ref, w_txt_ref, b_txt_ref,
                 x_img_ref, w_img_ref, b_img_ref,
                 wci_ref, wct_ref, bcls_ref, out_ref):
    B, S = ids_ref.shape
    V = emb_ref.shape[0]

    # ---- text branch: mask-weighted embedding pooling via one-hot matmul ----
    ids = ids_ref[...]                                             # [B,S] i32
    mask = mask_ref[...]                                           # [B,S] f32
    vocab_iota = lax.broadcasted_iota(jnp.int32, (B, S, V), 2)     # [B,S,V]
    onehot = (ids[:, :, None] == vocab_iota).astype(jnp.float32)   # [B,S,V]
    counts = jnp.sum(onehot * mask[:, :, None], axis=1)            # [B,V]
    # sum_s mask[b,s] * emb_table[ids[b,s]]  ==  counts @ emb_table
    pooled_sum = jnp.dot(counts, emb_ref[...],
                         preferred_element_type=jnp.float32)       # [B,H]
    denom = jnp.maximum(jnp.sum(mask, axis=1, keepdims=True), 1.0)  # [B,1]
    pooled = pooled_sum * pl.reciprocal(denom, approx=True)        # [B,H]

    txt = (jnp.dot(pooled.astype(jnp.bfloat16), w_txt_ref[...],
                   preferred_element_type=jnp.float32)
           + b_txt_ref[...])                                       # [B,256]

    # ---- image branch: linear projection of flattened pixels ----
    img = (jnp.dot(x_img_ref[...], w_img_ref[...],
                   preferred_element_type=jnp.float32)
           + b_img_ref[...])                                       # [B,512]

    # ---- concat + classifier (split-weight trick), lane-padded output ----
    logits = (jnp.dot(img.astype(jnp.bfloat16), wci_ref[...],
                      preferred_element_type=jnp.float32)
              + jnp.dot(txt.astype(jnp.bfloat16), wct_ref[...],
                        preferred_element_type=jnp.float32)
              + bcls_ref[...])                                     # [B,NC_PAD]
    out_ref[...] = logits.astype(out_ref.dtype)


def fused_call(ids, mask, emb_table, w_txt, b_txt, x_img, w_img, b_img,
               w_cls_img, w_cls_txt, b_cls):
    B_pad = ids.shape[0]
    vmem = pl.BlockSpec(memory_space=pltpu.MemorySpace.VMEM)
    return pl.pallas_call(
        fused_kernel,
        out_shape=jax.ShapeDtypeStruct((B_pad, NC_PAD), jnp.float32),
        in_specs=[vmem] * 11,
        out_specs=vmem,
    )(ids, mask, emb_table, w_txt, b_txt, x_img, w_img, b_img,
      w_cls_img, w_cls_txt, b_cls)


# --------------------------------------------------------------------------
# Full forward (wrapper: flatten, batch/lane padding, bf16 weight casts)
# --------------------------------------------------------------------------
def forward(params, images, input_ids, attention_mask):
    B = images.shape[0]
    pad_b = (-B) % SUBLANE          # pad batch to f32 sublane granularity

    x_img = images.reshape(B, -1).astype(jnp.float32)
    x_img = jnp.pad(x_img, ((0, pad_b), (0, 0))).astype(jnp.bfloat16)
    ids = jnp.pad(input_ids.astype(jnp.int32), ((0, pad_b), (0, 0)))
    mask = jnp.pad(attention_mask.astype(jnp.float32), ((0, pad_b), (0, 0)))

    pad_c = NC_PAD - NUM_CLASSES    # lane-pad classifier output to 128
    w_cls_img = jnp.pad(params["w_cls_img"], ((0, 0), (0, pad_c))).astype(jnp.bfloat16)
    w_cls_txt = jnp.pad(params["w_cls_txt"], ((0, 0), (0, pad_c))).astype(jnp.bfloat16)
    b_cls = jnp.pad(params["b_cls"], ((0, 0), (0, pad_c)))

    logits_pad = fused_call(
        ids, mask, params["emb_table"],
        params["w_txt"].astype(jnp.bfloat16), params["b_txt"],
        x_img, params["w_img"].astype(jnp.bfloat16), params["b_img"],
        w_cls_img, w_cls_txt, b_cls)
    return logits_pad[:B, :NUM_CLASSES]


# --------------------------------------------------------------------------
# Pure-JAX f32 reference (same stand-in semantics)
# --------------------------------------------------------------------------
def reference(params, images, input_ids, attention_mask):
    B = images.shape[0]
    x_img = images.reshape(B, -1).astype(jnp.float32)
    img_feat = x_img @ params["w_img"] + params["b_img"]
    emb = jnp.take(params["emb_table"], input_ids, axis=0)
    mask = attention_mask.astype(jnp.float32)
    pooled = (emb * mask[:, :, None]).sum(1) / jnp.maximum(
        mask.sum(1, keepdims=True), 1.0)
    txt_feat = pooled @ params["w_txt"] + params["b_txt"]
    feats = jnp.concatenate([img_feat, txt_feat], axis=1)
    w_cls = jnp.concatenate([params["w_cls_img"], params["w_cls_txt"]], axis=0)
    return feats @ w_cls + params["b_cls"]


if __name__ == "__main__":
    key = jax.random.PRNGKey(0)
    keys = jax.random.split(key, 10)
    params = {
        "emb_table": 0.02 * jax.random.normal(keys[0], (VOCAB, HIDDEN), jnp.float32),
        "w_img":     0.02 * jax.random.normal(keys[1], (D_IMG, IMG_FEAT), jnp.float32),
        "b_img":     0.02 * jax.random.normal(keys[2], (1, IMG_FEAT), jnp.float32),
        "w_txt":     0.02 * jax.random.normal(keys[3], (HIDDEN, TXT_FEAT), jnp.float32),
        "b_txt":     0.02 * jax.random.normal(keys[4], (1, TXT_FEAT), jnp.float32),
        "w_cls_img": 0.02 * jax.random.normal(keys[5], (IMG_FEAT, NUM_CLASSES), jnp.float32),
        "w_cls_txt": 0.02 * jax.random.normal(keys[6], (TXT_FEAT, NUM_CLASSES), jnp.float32),
        "b_cls":     0.02 * jax.random.normal(keys[7], (1, NUM_CLASSES), jnp.float32),
    }

    images = jax.random.normal(keys[8], (2, IMG_C, IMG_H, IMG_W), jnp.float32)
    input_ids = jax.random.randint(keys[9], (2, SEQ), 0, VOCAB, dtype=jnp.int32)
    attention_mask = jnp.array([[1, 1, 1, 1, 1, 0, 0, 0],
                                [1, 1, 1, 1, 1, 1, 1, 1]], dtype=jnp.int32)

    out = jax.block_until_ready(forward(params, images, input_ids, attention_mask))
    ref = reference(params, images, input_ids, attention_mask)
    # bf16 matmul operands + approx reciprocal -> relaxed tolerance vs f32 ref.
    np.testing.assert_allclose(np.asarray(out), np.asarray(ref), rtol=2e-2, atol=1e-2)
    assert out.shape == (2, NUM_CLASSES)
    print("KERNEL_OK")
</pallas_src>

<mosaic_0001>
module attributes {stable_mosaic.version = 11 : i64} {
  func.func @fused_kernel(%arg0: memref<8x8xi32, #tpu.memory_space<vmem>>, %arg1: memref<8x8xf32, #tpu.memory_space<vmem>>, %arg2: memref<128x768xf32, #tpu.memory_space<vmem>>, %arg3: memref<768x256xbf16, #tpu.memory_space<vmem>>, %arg4: memref<1x256xf32, #tpu.memory_space<vmem>>, %arg5: memref<8x768xbf16, #tpu.memory_space<vmem>>, %arg6: memref<768x512xbf16, #tpu.memory_space<vmem>>, %arg7: memref<1x512xf32, #tpu.memory_space<vmem>>, %arg8: memref<512x128xbf16, #tpu.memory_space<vmem>>, %arg9: memref<256x128xbf16, #tpu.memory_space<vmem>>, %arg10: memref<1x128xf32, #tpu.memory_space<vmem>>, %arg11: memref<8x128xf32, #tpu.memory_space<vmem>>) attributes {dimension_semantics = [], scalar_prefetch = 0 : i64, scratch_operands = 0 : i64, tpu.core_type = #tpu.core_type<tc>} {
    %c0 = arith.constant 0 : index
    %c0_0 = arith.constant 0 : index
    %0 = vector.load %arg0[%c0, %c0_0] : memref<8x8xi32, #tpu.memory_space<vmem>>, vector<8x8xi32>
    %c0_1 = arith.constant 0 : index
    %c0_2 = arith.constant 0 : index
    %1 = vector.load %arg1[%c0_1, %c0_2] : memref<8x8xf32, #tpu.memory_space<vmem>>, vector<8x8xf32>
    %2 = tpu.iota {dimensions = array<i32: 2>} : vector<8x8x128xi32>
    %3 = vector.shape_cast %0 : vector<8x8xi32> to vector<8x8x1xi32>
    %4 = vector.broadcast %3 : vector<8x8x1xi32> to vector<8x8x128xi32>
    %5 = arith.cmpi eq, %4, %2 : vector<8x8x128xi32>
    %6 = arith.extui %5 : vector<8x8x128xi1> to vector<8x8x128xi32>
    %7 = arith.sitofp %6 : vector<8x8x128xi32> to vector<8x8x128xf32>
    %8 = vector.shape_cast %1 : vector<8x8xf32> to vector<8x8x1xf32>
    %9 = vector.broadcast %8 : vector<8x8x1xf32> to vector<8x8x128xf32>
    %10 = arith.mulf %7, %9 : vector<8x8x128xf32>
    %cst = arith.constant dense<0.000000e+00> : vector<8x128xf32>
    %11 = vector.multi_reduction <add>, %10, %cst [1] : vector<8x8x128xf32> to vector<8x128xf32>
    %c0_3 = arith.constant 0 : index
    %c0_4 = arith.constant 0 : index
    %12 = vector.load %arg2[%c0_3, %c0_4] : memref<128x768xf32, #tpu.memory_space<vmem>>, vector<128x768xf32>
    %cst_5 = arith.constant dense<0.000000e+00> : vector<8x768xf32>
    %13 = tpu.matmul %11, %12, %cst_5 {dimension_numbers = #tpu.dot_dimension_numbers<[1], [0], [0], [1], [0, 0, 1, 1], [], []>} : vector<8x128xf32>, vector<128x768xf32>, vector<8x768xf32> -> vector<8x768xf32>
    %cst_6 = arith.constant dense<0.000000e+00> : vector<8xf32>
    %14 = vector.multi_reduction <add>, %1, %cst_6 [1] : vector<8x8xf32> to vector<8xf32>
    %15 = vector.shape_cast %14 : vector<8xf32> to vector<8x1xf32>
    %cst_7 = arith.constant 1.000000e+00 : f32
    %16 = vector.broadcast %cst_7 : f32 to vector<8x1xf32>
    %17 = arith.maximumf %15, %16 : vector<8x1xf32>
    %18 = tpu.reciprocal %17 {approx = true} : vector<8x1xf32> -> vector<8x1xf32>
    %19 = vector.broadcast %18 : vector<8x1xf32> to vector<8x768xf32>
    %20 = arith.mulf %13, %19 : vector<8x768xf32>
    %21 = arith.truncf %20 : vector<8x768xf32> to vector<8x768xbf16>
    %c0_8 = arith.constant 0 : index
    %c0_9 = arith.constant 0 : index
    %22 = vector.load %arg3[%c0_8, %c0_9] : memref<768x256xbf16, #tpu.memory_space<vmem>>, vector<768x256xbf16>
    %cst_10 = arith.constant dense<0.000000e+00> : vector<8x256xf32>
    %23 = tpu.matmul %21, %22, %cst_10 {dimension_numbers = #tpu.dot_dimension_numbers<[1], [0], [0], [1], [0, 0, 1, 1], [], []>} : vector<8x768xbf16>, vector<768x256xbf16>, vector<8x256xf32> -> vector<8x256xf32>
    %c0_11 = arith.constant 0 : index
    %c0_12 = arith.constant 0 : index
    %24 = vector.load %arg4[%c0_11, %c0_12] : memref<1x256xf32, #tpu.memory_space<vmem>>, vector<1x256xf32>
    %25 = vector.broadcast %24 : vector<1x256xf32> to vector<8x256xf32>
    %26 = arith.addf %23, %25 : vector<8x256xf32>
    %c0_13 = arith.constant 0 : index
    %c0_14 = arith.constant 0 : index
    %27 = vector.load %arg5[%c0_13, %c0_14] : memref<8x768xbf16, #tpu.memory_space<vmem>>, vector<8x768xbf16>
    %c0_15 = arith.constant 0 : index
    %c0_16 = arith.constant 0 : index
    %28 = vector.load %arg6[%c0_15, %c0_16] : memref<768x512xbf16, #tpu.memory_space<vmem>>, vector<768x512xbf16>
    %cst_17 = arith.constant dense<0.000000e+00> : vector<8x512xf32>
    %29 = tpu.matmul %27, %28, %cst_17 {dimension_numbers = #tpu.dot_dimension_numbers<[1], [0], [0], [1], [0, 0, 1, 1], [], []>} : vector<8x768xbf16>, vector<768x512xbf16>, vector<8x512xf32> -> vector<8x512xf32>
    %c0_18 = arith.constant 0 : index
    %c0_19 = arith.constant 0 : index
    %30 = vector.load %arg7[%c0_18, %c0_19] : memref<1x512xf32, #tpu.memory_space<vmem>>, vector<1x512xf32>
    %31 = vector.broadcast %30 : vector<1x512xf32> to vector<8x512xf32>
    %32 = arith.addf %29, %31 : vector<8x512xf32>
    %33 = arith.truncf %32 : vector<8x512xf32> to vector<8x512xbf16>
    %c0_20 = arith.constant 0 : index
    %c0_21 = arith.constant 0 : index
    %34 = vector.load %arg8[%c0_20, %c0_21] : memref<512x128xbf16, #tpu.memory_space<vmem>>, vector<512x128xbf16>
    %cst_22 = arith.constant dense<0.000000e+00> : vector<8x128xf32>
    %35 = tpu.matmul %33, %34, %cst_22 {dimension_numbers = #tpu.dot_dimension_numbers<[1], [0], [0], [1], [0, 0, 1, 1], [], []>} : vector<8x512xbf16>, vector<512x128xbf16>, vector<8x128xf32> -> vector<8x128xf32>
    %36 = arith.truncf %26 : vector<8x256xf32> to vector<8x256xbf16>
    %c0_23 = arith.constant 0 : index
    %c0_24 = arith.constant 0 : index
    %37 = vector.load %arg9[%c0_23, %c0_24] : memref<256x128xbf16, #tpu.memory_space<vmem>>, vector<256x128xbf16>
    %cst_25 = arith.constant dense<0.000000e+00> : vector<8x128xf32>
    %38 = tpu.matmul %36, %37, %cst_25 {dimension_numbers = #tpu.dot_dimension_numbers<[1], [0], [0], [1], [0, 0, 1, 1], [], []>} : vector<8x256xbf16>, vector<256x128xbf16>, vector<8x128xf32> -> vector<8x128xf32>
    %39 = arith.addf %35, %38 : vector<8x128xf32>
    %c0_26 = arith.constant 0 : index
    %c0_27 = arith.constant 0 : index
    %40 = vector.load %arg10[%c0_26, %c0_27] : memref<1x128xf32, #tpu.memory_space<vmem>>, vector<1x128xf32>
    %41 = vector.broadcast %40 : vector<1x128xf32> to vector<8x128xf32>
    %42 = arith.addf %39, %41 : vector<8x128xf32>
    %c0_28 = arith.constant 0 : index
    %c0_29 = arith.constant 0 : index
    %43 = vector.load %arg11[%c0_28, %c0_29] : memref<8x128xf32, #tpu.memory_space<vmem>>, vector<8x128xf32>
    tpu.vector_store %arg11[%c0_28, %c0_29], %42 {strides = array<i32>} : memref<8x128xf32, #tpu.memory_space<vmem>>, vector<8x128xf32>,
    return
  }
}

</mosaic_0001>

<bundles_post_ra>
// kernel: tpu_custom_call.1
= control target key start
LH: loop header
LB: loop body
LE: loop exit
PB: predicated region body
PF: predicated region fallthrough
CT: control target
= control target key end

     0   :  { %16 = vsyncpa [#allocation3], 0  ;;  %s4978_s0 = inlined_call_operand.hbm [shape: s32[8,8], index: 0, kind: input, shape index: {}]   ;;  %s4979_s1 = inlined_call_operand.hbm [shape: f32[8,8], index: 1, kind: input, shape index: {}]   ;;  %s4980_s2 = inlined_call_operand.hbm [shape: f32[128,768], index: 2, kind: input, shape index: {}]   ;;  %s4981_s3 = inlined_call_operand.hbm [shape: bf16[768,256], index: 3, kind: input, shape index: {}]   ;;  %s4982_s4 = inlined_call_operand.vmem [shape: f32[1,256], index: 4, kind: input, shape index: {}]   ;;  %s4983_s5 = inlined_call_operand.hbm [shape: bf16[8,768], index: 5, kind: input, shape index: {}]   ;;  %s4984_s6 = inlined_call_operand.hbm [shape: bf16[768,512], index: 6, kind: input, shape index: {}]   ;;  %s4985_s7 = inlined_call_operand.vmem [shape: f32[1,512], index: 7, kind: input, shape index: {}]   ;;  %s4986_s8 = inlined_call_operand.hbm [shape: bf16[512,128], index: 8, kind: input, shape index: {}]   ;;  %s4987_s9 = inlined_call_operand.hbm [shape: bf16[256,128], index: 9, kind: input, shape index: {}]   ;;  %s4988_s10 = inlined_call_operand.vmem [shape: f32[1,128], index: 10, kind: input, shape index: {}]   ;;  %s4989_s11 = inlined_call_operand.hbm [shape: f32[8,128], index: 11, kind: output, shape index: {}]  }
   0x1   :  { %17 = vsyncpa [#allocation6], 0 }
   0x2   :  { %18 = vsyncpa [#allocation9], 0 }
   0x3   :  { %19 = vsyncpa [#allocation12], 0 }
   0x4   :  { %20 = vsyncpa [#allocation15], 0 }
   0x5   :  { %21 = vsyncpa [#allocation4], 0  ;;  %s4641_s17 = smov [#allocation5]   ;;  %s4642_s19 = smov [#allocation8]  }
   0x6   :  { %s38_s18 = sshll.u32 %s4641_s17, 4  ;;  %s59_s20 = sshll.u32 %s4642_s19, 4  ;;  %s39_s18 = int_to_ptr.vmem [resolvable:$true] %s38_s18  ;;  %s4719_s20 = int_to_ptr.vmem [resolvable:$true] %s59_s20 }
   0x7   :  { %s4431_s23 = scalar_lea.hbm %s4979_s1, 128 }
   0x8   :  { %p4432_p0 = scmp.ne.s32.totalorder %s4979_s1, %s4431_s23  ;;  %p4435_p1 = scmp.lt.u32.totalorder %s4431_s23, %s4979_s1 }
   0xa   :  { %p4437_p2 = pnand %p4435_p1, %p4432_p0 }
   0xc   :  { %4440 = shalt.err (!%p4437_p2)
}
   0xd   :  { %s4441_s28 = scalar_lea.vmem %s39_s18, 128  ;;  %p4446_p4 = scmp.lt.s32.totalorder %s39_s18, %s39_s18 }
   0xe   :  { %p4442_p3 = scmp.ne.s32.totalorder %s39_s18, %s4441_s28  ;;  %p4447_p5 = scmp.lt.s32.totalorder %s4441_s28, %s4441_s28 }
  0x10   :  { %p4448_p6 = por %p4447_p5, %p4446_p4 }
  0x12   :  { %p4449_p7 = pnand %p4448_p6, %p4442_p3 }
  0x14   :  { %4452 = shalt.err (!%p4449_p7)
}
  0x15   :  { %41 = dma.hbm_to_vmem [thread:$0]  %s4979_s1, 128, %s39_s18, [#allocation6]  }
  0x16   :  { %s4453_s14 = scalar_lea.hbm %s4981_s3, 12288 }
  0x17   :  { %p4454_p8 = scmp.ne.s32.totalorder %s4981_s3, %s4453_s14  ;;  %p4457_p9 = scmp.lt.u32.totalorder %s4453_s14, %s4981_s3 }
  0x19   :  { %p4459_p10 = pnand %p4457_p9, %p4454_p8 }
  0x1b   :  { %4462 = shalt.err (!%p4459_p10)
}
  0x1c   :  { %s4463_s21 = scalar_lea.vmem %s4719_s20, 12288  ;;  %p4468_p12 = scmp.lt.s32.totalorder %s4719_s20, %s4719_s20 }
  0x1d   :  { %p4464_p11 = scmp.ne.s32.totalorder %s4719_s20, %s4463_s21  ;;  %p4469_p13 = scmp.lt.s32.totalorder %s4463_s21, %s4463_s21 }
  0x1f   :  { %p4470_p0 = por %p4469_p13, %p4468_p12 }
  0x21   :  { %p4471_p1 = pnand %p4470_p0, %p4464_p11 }
  0x23   :  { %4474 = shalt.err (!%p4471_p1)
}
  0x24   :  { %s4643_s1 = smov 128   ;;  %s4644_s18 = smov 8  }
  0x25   :  { %65 = dma.hbm_to_vmem [thread:$0]  %s4981_s3, 12288, %s4719_s20, [#allocation9], %s4643_s1, %s4643_s1, %s4644_s18  }
  0x26   :  { %s4645_s24 = smov [#allocation11]   ;;  %s4475_s28 = scalar_lea.hbm %s4984_s6, 24576 }
  0x27   :  { %s83_s25 = sshll.u32 %s4645_s24, 4  ;;  %p4476_p2 = scmp.ne.s32.totalorder %s4984_s6, %s4475_s28  ;;  %s84_s25 = int_to_ptr.vmem [resolvable:$true] %s83_s25 }
  0x28   :  { %p4479_p3 = scmp.lt.u32.totalorder %s4475_s28, %s4984_s6 }
  0x2a   :  { %p4481_p4 = pnand %p4479_p3, %p4476_p2 }
  0x2c   :  { %4484 = shalt.err (!%p4481_p4)
}
  0x2d   :  { %s4485_s14 = scalar_lea.vmem %s84_s25, 24576  ;;  %p4490_p6 = scmp.lt.s32.totalorder %s84_s25, %s84_s25 }
  0x2e   :  { %p4486_p5 = scmp.ne.s32.totalorder %s84_s25, %s4485_s14  ;;  %p4491_p7 = scmp.lt.s32.totalorder %s4485_s14, %s4485_s14 }
  0x30   :  { %p4492_p8 = por %p4491_p7, %p4490_p6 }
  0x32   :  { %p4493_p9 = pnand %p4492_p8, %p4486_p5 }
  0x34   :  { %4496 = shalt.err (!%p4493_p9)
}
  0x35   :  { %s4646_s3 = smov 256   ;;  %s4647_s20 = smov 16  }
  0x36   :  { %89 = dma.hbm_to_vmem [thread:$0]  %s4984_s6, 24576, %s84_s25, [#allocation12], %s4646_s3, %s4646_s3, %s4647_s20  }
  0x37   :  { %s4648_s17 = smov [#allocation2]   ;;  %s4649_s21 = smov [#allocation7]  }
  0x38   :  { %s28_s19 = sshll.u32 %s4648_s17, 4  ;;  %s47_s1 = sshll.u32 %s4649_s21, 4  ;;  %s29_s19 = int_to_ptr.vmem [resolvable:$true] %s28_s19  ;;  %s48_s1 = int_to_ptr.vmem [resolvable:$true] %s47_s1 }
  0x39   :  { %s4497_s23 = scalar_lea.hbm %s4978_s0, 128 }
  0x3a   :  { %p4498_p10 = scmp.ne.s32.totalorder %s4978_s0, %s4497_s23  ;;  %p4501_p11 = scmp.lt.u32.totalorder %s4497_s23, %s4978_s0 }
  0x3c   :  { %p4503_p12 = pnand %p4501_p11, %p4498_p10 }
  0x3e   :  { %4506 = shalt.err (!%p4503_p12)
}
  0x3f   :  { %s4507_s6 = scalar_lea.vmem %s29_s19, 128  ;;  %p4512_p0 = scmp.lt.s32.totalorder %s29_s19, %s29_s19 }
  0x40   :  { %p4508_p13 = scmp.ne.s32.totalorder %s29_s19, %s4507_s6  ;;  %p4513_p1 = scmp.lt.s32.totalorder %s4507_s6, %s4507_s6 }
  0x42   :  { %p4514_p2 = por %p4513_p1, %p4512_p0 }
  0x44   :  { %p4515_p3 = pnand %p4514_p2, %p4508_p13 }
  0x46   :  { %4518 = shalt.err (!%p4515_p3)
}
  0x47   :  { %31 = dma.hbm_to_vmem [thread:$0]  %s4978_s0, 128, %s29_s19, [#allocation3]  }
  0x48   :  { %s4519_s13 = scalar_lea.hbm %s4980_s2, 12288 }
  0x49   :  { %p4520_p4 = scmp.ne.s32.totalorder %s4980_s2, %s4519_s13  ;;  %p4523_p5 = scmp.lt.u32.totalorder %s4519_s13, %s4980_s2 }
  0x4b   :  { %p4525_p6 = pnand %p4523_p5, %p4520_p4 }
  0x4d   :  { %4528 = shalt.err (!%p4525_p6)
}
  0x4e   :  { %s4529_s16 = scalar_lea.vmem %s48_s1, 12288  ;;  %p4534_p8 = scmp.lt.s32.totalorder %s48_s1, %s48_s1 }
  0x4f   :  { %p4530_p7 = scmp.ne.s32.totalorder %s48_s1, %s4529_s16  ;;  %p4535_p9 = scmp.lt.s32.totalorder %s4529_s16, %s4529_s16 }
  0x51   :  { %p4536_p10 = por %p4535_p9, %p4534_p8 }
  0x53   :  { %p4537_p11 = pnand %p4536_p10, %p4530_p7 }
  0x55   :  { %4540 = shalt.err (!%p4537_p11)
}
  0x56   :  { %s4650_s0 = smov 768   ;;  %s4651_s17 = smov 48  }
  0x57   :  { %53 = dma.hbm_to_vmem [thread:$0]  %s4980_s2, 12288, %s48_s1, [#allocation6], %s4650_s0, %s4650_s0, %s4651_s17  }
  0x58   :  { %s4652_s18 = smov [#allocation10]   ;;  %s4653_s23 = smov [#allocation13]  }
  0x59   :  { %s74_s22 = sshll.u32 %s4652_s18, 4  ;;  %s97_s24 = sshll.u32 %s4653_s23, 4  ;;  %s75_s22 = int_to_ptr.vmem [resolvable:$true] %s74_s22  ;;  %s98_s24 = int_to_ptr.vmem [resolvable:$true] %s97_s24 }
  0x5a   :  { %s4541_s28 = scalar_lea.hbm %s4983_s5, 384 }
  0x5b   :  { %p4542_p12 = scmp.ne.s32.totalorder %s4983_s5, %s4541_s28  ;;  %p4545_p13 = scmp.lt.u32.totalorder %s4541_s28, %s4983_s5 }
  0x5d   :  { %p4547_p0 = pnand %p4545_p13, %p4542_p12 }
  0x5f   :  { %4550 = shalt.err (!%p4547_p0)
}
  0x60   :  { %s4551_s2 = scalar_lea.vmem %s75_s22, 384  ;;  %p4556_p2 = scmp.lt.s32.totalorder %s75_s22, %s75_s22 }
  0x61   :  { %p4552_p1 = scmp.ne.s32.totalorder %s75_s22, %s4551_s2  ;;  %p4557_p3 = scmp.lt.s32.totalorder %s4551_s2, %s4551_s2 }
  0x63   :  { %p4558_p4 = por %p4557_p3, %p4556_p2 }
  0x65   :  { %p4559_p5 = pnand %p4558_p4, %p4552_p1 }
  0x67   :  { %4562 = shalt.err (!%p4559_p5)
}
  0x68   :  { %77 = dma.hbm_to_vmem [thread:$0]  %s4983_s5, 384, %s75_s22, [#allocation9]  }
  0x69   :  { %s4563_s3 = scalar_lea.hbm %s4986_s8, 4096 }
  0x6a   :  { %p4564_p6 = scmp.ne.s32.totalorder %s4986_s8, %s4563_s3  ;;  %p4567_p7 = scmp.lt.u32.totalorder %s4563_s3, %s4986_s8 }
  0x6c   :  { %p4569_p8 = pnand %p4567_p7, %p4564_p6 }
  0x6e   :  { %4572 = shalt.err (!%p4569_p8)
}
  0x6f   :  { %s4573_s17 = scalar_lea.vmem %s98_s24, 4096  ;;  %p4578_p10 = scmp.lt.s32.totalorder %s98_s24, %s98_s24 }
  0x70   :  { %p4574_p9 = scmp.ne.s32.totalorder %s98_s24, %s4573_s17  ;;  %p4579_p11 = scmp.lt.s32.totalorder %s4573_s17, %s4573_s17 }
  0x72   :  { %p4580_p12 = por %p4579_p11, %p4578_p10 }
  0x74   :  { %p4581_p13 = pnand %p4580_p12, %p4574_p9 }
  0x76   :  { %4584 = shalt.err (!%p4581_p13)
}
  0x77   :  { %s4654_s5 = smov 64   ;;  %s4655_s19 = smov 4  }
  0x78   :  { %103 = dma.hbm_to_vmem [thread:$0]  %s4986_s8, 4096, %s98_s24, [#allocation12], %s4654_s5, %s4654_s5, %s4655_s19  }
  0x79   :  { %s4656_s22 = smov [#allocation14]   ;;  %s4585_s28 = scalar_lea.hbm %s4987_s9, 2048 }
  0x7a   :  { %s109_s23 = sshll.u32 %s4656_s22, 4  ;;  %p4586_p0 = scmp.ne.s32.totalorder %s4987_s9, %s4585_s28  ;;  %s110_s23 = int_to_ptr.vmem [resolvable:$true] %s109_s23 }
  0x7b   :  { %p4589_p1 = scmp.lt.u32.totalorder %s4585_s28, %s4987_s9 }
  0x7d   :  { %p4591_p2 = pnand %p4589_p1, %p4586_p0 }
  0x7f   :  { %4594 = shalt.err (!%p4591_p2)
}
  0x80   :  { %s4595_s2 = scalar_lea.vmem %s110_s23, 2048  ;;  %p4600_p4 = scmp.lt.s32.totalorder %s110_s23, %s110_s23 }
  0x81   :  { %p4596_p3 = scmp.ne.s32.totalorder %s110_s23, %s4595_s2  ;;  %p4601_p5 = scmp.lt.s32.totalorder %s4595_s2, %s4595_s2 }
  0x83   :  { %p4602_p6 = por %p4601_p5, %p4600_p4 }
  0x85   :  { %p4603_p7 = pnand %p4602_p6, %p4596_p3 }
  0x87   :  { %4606 = shalt.err (!%p4603_p7)
}
  0x88   :  { %115 = dma.hbm_to_vmem [thread:$0]  %s4987_s9, 2048, %s110_s23, [#allocation15], %s4654_s5, %s4654_s5, %s4655_s19  }
  0x89   :  { %4629 = dma.done.wait [#allocation3], 128  }
  0x8a   :  { %4630 = vsyncadd [#allocation3], 4294967168 }
  0x8b   :  { %4631 = dma.done.wait [#allocation6], 12416  }
  0x8c   :  { %4632 = vsyncadd [#allocation6], 4294954880 }
  0x8d   :  { %4633 = dma.done.wait [#allocation9], 12672  }
  0x8e   :  { %4634 = vsyncadd [#allocation9], 4294954624 }
  0x8f   :  { %4635 = dma.done.wait [#allocation12], 28672  }
  0x90   :  { %4636 = vsyncadd [#allocation12], 4294938624 }
  0x91   :  { %4637 = dma.done.wait [#allocation15], 2048  }
  0x92   :  { %4638 = vsyncadd [#allocation15], 4294965248  ;;  %v145_v0 = vlaneseq  ;;  %v4657_v1 = vmov 0.0   ;;  %v4838_v7 = vld [vmem:[#allocation2] sm:$0xff]  ;;  %v340_v8 = vld [vmem:[#allocation7 + $0x8] sm:$0xff]  ;;  %vm671_vm0 = vcmask 64512  }
  0x93   :  { %522 = vmatprep.mubr.f32.mxu0 %v4657_v1  ;;  %v346_v11 = vld [vmem:[#allocation7 + $0x38] sm:$0xff]  ;;  %v339_v12 = vld [vmem:[#allocation7] sm:$0xff]  ;;  %v345_v13 = vld [vmem:[#allocation7 + $0x30] sm:$0xff]  ;;  %vm443_vm9 = vcmask 1041409   ;;  %vm445_vm10 = vcmask 1042434   ;;  %vm447_vm11 = vcmask 1043459  }
  0x94   :  { %v4824_v2 = vshrl.u32 %v145_v0, 7  ;;  %v4844_v14 = vld [vmem:[#allocation5] sm:$0xff]  ;;  %v352_v15 = vld [vmem:[#allocation7 + $0x68] sm:$0xff]  ;;  %v351_v19 = vld [vmem:[#allocation7 + $0x60] sm:$0xff]  ;;  %v3799_v21 = vpack.c.bf16 %v346_v11, %v340_v8  ;;  %v3801_v22 = vpack.c.bf16 %v345_v13, %v339_v12  ;;  %vm449_vm12 = vcmask 1044484   ;;  %s4658_s14 = smov [#allocation16]  }
  0x95   :  { %v358_v16 = vld [vmem:[#allocation7 + $0x98] sm:$0xff]  ;;  %v357_v20 = vld [vmem:[#allocation7 + $0x90] sm:$0xff]  ;;  %v364_v27 = vld [vmem:[#allocation7 + $0xc8] sm:$0xff]  ;;  %vm451_vm13 = vcmask 1045509   ;;  %vm453_vm14 = vcmask 1046534   ;;  %vm455_vm15 = vcmask 1047559  }
  0x96   :  { %v4827_v3 = vsub.s32 2, %v4824_v2  ;;  %v4830_v4 = vsub.s32 0, %v4824_v2  ;;  %v4833_v5 = vsub.s32 3, %v4824_v2  ;;  %v4836_v6 = vsub.s32 1, %v4824_v2  ;;  %v370_v28 = vld [vmem:[#allocation7 + $0xf8] sm:$0xff]  ;;  %3800 = vmatprep.subr.bf16.mxu0 %v3799_v21  ;;  %v363_v29 = vld [vmem:[#allocation7 + $0xc0] sm:$0xff] }
  0x97   :  { %v3803_v23 = vpack.c.bf16 %v358_v16, %v352_v15  ;;  %v177_v26 = vsub.s32 4, %v4824_v2  ;;  %v369_v30 = vld [vmem:[#allocation7 + $0xf0] sm:$0xff]  ;;  %3802 = vmatpush1.bf16.msra.mxu0 %v3801_v22  ;;  %v3805_v31 = vpack.c.bf16 %v357_v20, %v351_v19  ;;  %v3807_v32 = vpack.c.bf16 %v370_v28, %v364_v27  ;;  %v376_v36 = vld [vmem:[#allocation7 + $0x128] sm:$0xff]  ;;  %v382_v37 = vld [vmem:[#allocation7 + $0x158] sm:$0xff]  ;;  %s3369_s3 = sshll.u32 %s4658_s14, 4  ;;  %s3370_s3 = int_to_ptr.vmem [resolvable:$true] %s3369_s3 }
  0x98   :  { %v164_v9 = vrot.slane %v4838_v7, %v4827_v3  ;;  %v150_v10 = vrot.slane %v4838_v7, %v4830_v4  ;;  %v171_v17 = vrot.slane %v4838_v7, %v4833_v5  ;;  %v157_v18 = vrot.slane %v4838_v7, %v4836_v6  ;;  %v375_v39 = vld [vmem:[#allocation7 + $0x120] sm:$0xff]  ;;  %v381_v40 = vld [vmem:[#allocation7 + $0x150] sm:$0xff]  ;;  %v388_v45 = vld [vmem:[#allocation7 + $0x188] sm:$0xff]  ;;  %s4607_s20 = scalar_lea.vmem %s3370_s3, 128  ;;  %p4612_p9 = scmp.lt.s32.totalorder %s3370_s3, %s3370_s3 }
  0x99   :  { %v237_v24 = vrot.slane %v4844_v14, %v4836_v6  ;;  %v230_v25 = vrot.slane %v4844_v14, %v4830_v4  ;;  %3804 = vmatprep.subr.bf16.mxu0 %v3803_v23  ;;  %v244_v33 = vrot.slane %v4844_v14, %v4827_v3  ;;  %v178_v34 = vrot.slane %v4838_v7, %v177_v26  ;;  %v394_v46 = vld [vmem:[#allocation7 + $0x1b8] sm:$0xff]  ;;  %v387_v48 = vld [vmem:[#allocation7 + $0x180] sm:$0xff]  ;;  %v393_v49 = vld [vmem:[#allocation7 + $0x1b0] sm:$0xff]  ;;  %p4608_p8 = scmp.ne.s32.totalorder %s3370_s3, %s4607_s20  ;;  %p4613_p10 = scmp.lt.s32.totalorder %s4607_s20, %s4607_s20 }
  0x9a   :  { %166 = vbcast.lane.b32.xlu1 %v164_v9, 256  ;;  %152 = vbcast.lane.b32.xlu0 %v150_v10, 256  ;;  %v184_v35 = vsub.s32 5, %v4824_v2  ;;  %v3809_v38 = vpack.c.bf16 %v369_v30, %v363_v29  ;;  %v3811_v41 = vpack.c.bf16 %v382_v37, %v376_v36  ;;  %v251_v42 = vrot.slane %v4844_v14, %v4833_v5  ;;  %v400_v54 = vld [vmem:[#allocation7 + $0x1e8] sm:$0xff]  ;;  %v406_v55 = vld [vmem:[#allocation7 + $0x218] sm:$0xff]  ;;  %v399_v57 = vld [vmem:[#allocation7 + $0x1e0] sm:$0xff] }
  0x9b   :  { %3806 = vmatpush1.bf16.msra.mxu0 %v3805_v31  ;;  %v191_v44 = vsub.s32 6, %v4824_v2  ;;  %v3813_v47 = vpack.c.bf16 %v381_v40, %v375_v39  ;;  %v3815_v50 = vpack.c.bf16 %v394_v46, %v388_v45  ;;  %v258_v51 = vrot.slane %v4844_v14, %v177_v26  ;;  %v405_v58 = vld [vmem:[#allocation7 + $0x210] sm:$0xff]  ;;  %v412_v62 = vld [vmem:[#allocation7 + $0x248] sm:$0xff]  ;;  %v418_v63 = vld [vmem:[#allocation7 + $0x278] sm:$0xff]  ;;  %p4614_p11 = por %p4613_p10, %p4612_p9 }
  0x9c   :  { %3808 = vmatprep.subr.bf16.mxu0 %v3807_v32  ;;  %v185_v43 = vrot.slane %v4838_v7, %v184_v35  ;;  %v198_v53 = vsub.s32 7, %v4824_v2  ;;  %v3817_v56 = vpack.c.bf16 %v393_v49, %v387_v48  ;;  %v3819_v59 = vpack.c.bf16 %v406_v55, %v400_v54  ;;  %v411_v9 = vld [vmem:[#allocation7 + $0x240] sm:$0xff]  ;;  %v417_v2 = vld [vmem:[#allocation7 + $0x270] sm:$0xff]  ;;  %v424_v13 = vld [vmem:[#allocation7 + $0x2a8] sm:$0xff] }
  0x9d   :  { %v192_v52 = vrot.slane %v4838_v7, %v191_v44  ;;  %v265_v60 = vrot.slane %v4844_v14, %v184_v35  ;;  %v3821_v8 = vpack.c.bf16 %v405_v58, %v399_v57  ;;  %v3823_v10 = vpack.c.bf16 %v418_v63, %v412_v62  ;;  %v430_v15 = vld [vmem:[#allocation7 + $0x2d8] sm:$0xff]  ;;  %v348_v20 = vld [vmem:[#allocation7 + $0x48] sm:$0xff]  ;;  %p4615_p12 = pnand %p4614_p11, %p4608_p8 }
  0x9e   :  { %173 = vbcast.lane.b32.xlu1 %v171_v17, 256  ;;  %159 = vbcast.lane.b32.xlu0 %v157_v18, 256  ;;  %v199_v61 = vrot.slane %v4838_v7, %v198_v53  ;;  %v279_v11 = vrot.slane %v4844_v14, %v198_v53  ;;  %v272_v12 = vrot.slane %v4844_v14, %v191_v44  ;;  %v423_v17 = vld [vmem:[#allocation7 + $0x2a0] sm:$0xff]  ;;  %v429_v7 = vld [vmem:[#allocation7 + $0x2d0] sm:$0xff]  ;;  %v342_v19 = vld [vmem:[#allocation7 + $0x18] sm:$0xff]  ;;  %v672_v23 = vsel %vm671_vm0, %v4844_v14, 0.0 }
  0x9f   :  { %3810 = vmatpush1.bf16.msra.mxu0 %v3809_v38  ;;  %v3825_v16 = vpack.c.bf16 %v417_v2, %v411_v9  ;;  %v3827_v18 = vpack.c.bf16 %v430_v15, %v424_v13  ;;  %v3829_v21 = vpack.c.bf16 %v429_v7, %v423_v17  ;;  %v3831_v22 = vpack.c.bf16 %v348_v20, %v342_v19  ;;  %v3946_v26 = vld [vmem:[#allocation8 + $0x14] ss:$8 sps:$4 sm:$0xff]   ;;  %v3948_v27 = vld [vmem:[#allocation8 + $0x10] ss:$8 sps:$4 sm:$0xff]   ;;  %v3949_v28 = vld [vmem:[#allocation8 + $0x24] ss:$8 sps:$4 sm:$0xff]  }
  0xa0   :  { %3812 = vmatprep.subr.bf16.mxu0 %v3811_v41  ;;  %v3951_v29 = vld [vmem:[#allocation8 + $0x20] ss:$8 sps:$4 sm:$0xff]   ;;  %v3952_v30 = vld [vmem:[#allocation8 + $0x34] ss:$8 sps:$4 sm:$0xff]   ;;  %v3954_v31 = vld [vmem:[#allocation8 + $0x30] ss:$8 sps:$4 sm:$0xff]  }
  0xa1   :  { %v3955_v32 = vld [vmem:[#allocation8 + $0x44] ss:$8 sps:$4 sm:$0xff]   ;;  %v3960_v14 = vld [vmem:[#allocation8 + $0x50] ss:$8 sps:$4 sm:$0xff]   ;;  %v4872_v38 = vand.u32 127, %v145_v0 }
  0xa2   :  { %239 = vbcast.lane.b32.xlu1 %v237_v24, 256  ;;  %232 = vbcast.lane.b32.xlu0 %v230_v25, 256  ;;  %v3943_v24 = vld [vmem:[#allocation8 + $0x4] ss:$8 sps:$4 sm:$0xff]   ;;  %v3945_v25 = vld [vmem:[#allocation8] ss:$8 sps:$4 sm:$0xff]  }
  0xa3   :  { %3814 = vmatpush1.bf16.msra.mxu0 %v3813_v47  ;;  %1277 = vmatprep.subr.bf16.mxu1 %v3943_v24  ;;  %v3961_v35 = vld [vmem:[#allocation8 + $0x64] ss:$8 sps:$4 sm:$0xff]   ;;  %v3963_v39 = vld [vmem:[#allocation8 + $0x60] ss:$8 sps:$4 sm:$0xff]   ;;  %v3964_v40 = vld [vmem:[#allocation8 + $0x74] ss:$8 sps:$4 sm:$0xff]  }
  0xa4   :  { %3816 = vmatprep.subr.bf16.mxu0 %v3815_v50  ;;  %1278 = vmatpush1.bf16.msra.mxu1 %v3945_v25  ;;  %v3970_v44 = vld [vmem:[#allocation8 + $0x84] ss:$8 sps:$4 sm:$0xff]   ;;  %v3972_v50 = vld [vmem:[#allocation8 + $0x80] ss:$8 sps:$4 sm:$0xff]   ;;  %v3976_v53 = vld [vmem:[#allocation8 + $0x94] ss:$8 sps:$4 sm:$0xff]  }
  0xa5   :  { %1279 = vmatprep.subr.bf16.mxu1 %v3946_v26  ;;  %v3982_v62 = vld [vmem:[#allocation8 + $0xa4] ss:$8 sps:$4 sm:$0xff]  }
  0xa6   :  { %246 = vbcast.lane.b32.xlu1 %v244_v33, 256  ;;  %180 = vbcast.lane.b32.xlu0 %v178_v34, 256  ;;  %v3957_v33 = vld [vmem:[#allocation8 + $0x40] ss:$8 sps:$4 sm:$0xff]   ;;  %v3958_v34 = vld [vmem:[#allocation8 + $0x54] ss:$8 sps:$4 sm:$0xff]  }
  0xa7   :  { %3818 = vmatpush1.bf16.msra.mxu0 %v3817_v56  ;;  %v3994_v25 = vld [vmem:[#allocation8 + $0xc4] ss:$8 sps:$4 sm:$0xff]  }
  0xa8   :  { %3820 = vmatprep.subr.bf16.mxu0 %v3819_v59  ;;  %1280 = vmatpush1.bf16.msra.mxu1 %v3948_v27 }
  0xa9   :  { %1281 = vmatprep.subr.bf16.mxu1 %v3949_v28 }
  0xaa   :  { %253 = vbcast.lane.b32.xlu1 %v251_v42, 256  ;;  %187 = vbcast.lane.b32.xlu0 %v185_v43, 256  ;;  %v3966_v43 = vld [vmem:[#allocation8 + $0x70] ss:$8 sps:$4 sm:$0xff]  }
  0xab   :  { %3822 = vmatpush1.bf16.msra.mxu0 %v3821_v8 }
  0xac   :  { %3824 = vmatprep.subr.bf16.mxu0 %v3823_v10  ;;  %1282 = vmatpush1.bf16.msra.mxu1 %v3951_v29 }
  0xad   :  { %1283 = vmatprep.subr.bf16.mxu1 %v3952_v30 }
  0xae   :  { %260 = vbcast.lane.b32.xlu1 %v258_v51, 256  ;;  %194 = vbcast.lane.b32.xlu0 %v192_v52, 256 }
  0xaf   :  { %3826 = vmatpush1.bf16.msra.mxu0 %v3825_v16  ;;  %v3988_v16 = vld [vmem:[#allocation8 + $0xb4] ss:$8 sps:$4 sm:$0xff]  }
  0xb0   :  { %3828 = vmatprep.subr.bf16.mxu0 %v3827_v18  ;;  %1284 = vmatpush1.bf16.msra.mxu1 %v3954_v31 }
  0xb1   :  { %1285 = vmatprep.subr.bf16.mxu1 %v3955_v32 }
  0xb2   :  { %267 = vbcast.lane.b32.xlu1 %v265_v60, 256  ;;  %201 = vbcast.lane.b32.xlu0 %v199_v61, 256  ;;  %v3978_v60 = vld [vmem:[#allocation8 + $0x90] ss:$8 sps:$4 sm:$0xff]  }
  0xb3   :  { %3830 = vmatpush1.bf16.msra.mxu0 %v3829_v21 }
  0xb4   :  { %3832 = vmatprep.subr.bf16.mxu0 %v3831_v22  ;;  %1286 = vmatpush1.bf16.msra.mxu1 %v3957_v33 }
  0xb5   :  { %1287 = vmatprep.subr.bf16.mxu1 %v3958_v34 }
  0xb6   :  { %281 = vbcast.lane.b32.xlu1 %v279_v11, 256  ;;  %274 = vbcast.lane.b32.xlu0 %v272_v12, 256  ;;  %v3984_v12 = vld [vmem:[#allocation8 + $0xa0] ss:$8 sps:$4 sm:$0xff]  }
  0xb8   :  { %1288 = vmatpush1.bf16.msra.mxu1 %v3960_v14  ;;  %v3996_v14 = vld [vmem:[#allocation8 + $0xc0] ss:$8 sps:$4 sm:$0xff]  }
  0xb9   :  { %1289 = vmatprep.subr.bf16.mxu1 %v3961_v35 }
  0xbc   :  { %1290 = vmatpush1.bf16.msra.mxu1 %v3963_v39  ;;  %v4000_v39 = vld [vmem:[#allocation8 + $0xd4] ss:$8 sps:$4 sm:$0xff]  }
  0xbd   :  { %1291 = vmatprep.subr.bf16.mxu1 %v3964_v40 }
  0xc0   :  { %1292 = vmatpush1.bf16.msra.mxu1 %v3966_v43 }
  0xc1   :  { %1293 = vmatprep.subr.bf16.mxu1 %v3970_v44 }
  0xc4   :  { %1294 = vmatpush1.bf16.msra.mxu1 %v3972_v50 }
  0xc5   :  { %1295 = vmatprep.subr.bf16.mxu1 %v3976_v53 }
  0xc8   :  { %1296 = vmatpush1.bf16.msra.mxu1 %v3978_v60  ;;  %v4008_v60 = vld [vmem:[#allocation8 + $0xe0] ss:$8 sps:$4 sm:$0xff]  }
  0xc9   :  { %1297 = vmatprep.subr.bf16.mxu1 %v3982_v62 }
  0xcc   :  { %1298 = vmatpush1.bf16.msra.mxu1 %v3984_v12  ;;  %v341_v12 = vld [vmem:[#allocation7 + $0x10] sm:$0xff] }
  0xcd   :  { %1299 = vmatprep.subr.bf16.mxu1 %v3988_v16 }
  0xd5   :  { %673 = vadd.xlane.f32.xlu0 %v672_v23  ;;  %v3990_v23 = vld [vmem:[#allocation8 + $0xb0] ss:$8 sps:$4 sm:$0xff]  }
  0xd6   :  { %1300 = vmatpush1.bf16.msra.mxu1 %v3990_v23 }
  0xd7   :  { %1301 = vmatprep.subr.bf16.mxu1 %v3994_v25  ;;  %v353_v25 = vld [vmem:[#allocation7 + $0x70] sm:$0xff] }
  0xda   :  { %1302 = vmatpush1.bf16.msra.mxu1 %v3996_v14  ;;  %v371_v14 = vld [vmem:[#allocation7 + $0x100] sm:$0xff] }
  0xdb   :  { %1303 = vmatprep.subr.bf16.mxu1 %v4000_v39 }
 0x10c   :  { %v167_v36 = vpop.permute.xlu1 %166  ;;  %v153_v37 = vpop.permute.xlu0 %152 }
 0x10d   :  { %vm203_vm1 = vcmp.eq.s32.totalorder %v153_v37, %v4872_v38  ;;  %vm205_vm3 = vcmp.eq.s32.totalorder %v167_v36, %v4872_v38 }
 0x10e   :  { %v3382_v47 = vsel %vm203_vm1, 1.0, %v4657_v1  ;;  %v3384_v54 = vsel %vm205_vm3, 1.0, %v4657_v1 }
 0x110   :  { %v174_v41 = vpop.permute.xlu1 %173  ;;  %v160_v42 = vpop.permute.xlu0 %159 }
 0x111   :  { %vm204_vm2 = vcmp.eq.s32.totalorder %v160_v42, %v4872_v38  ;;  %vm206_vm4 = vcmp.eq.s32.totalorder %v174_v41, %v4872_v38 }
 0x112   :  { %v3383_v46 = vsel %vm204_vm2, 1.0, %v4657_v1  ;;  %v3385_v63 = vsel %vm206_vm4, 1.0, %v4657_v1 }
 0x114   :  { %v240_v45 = vpop.permute.xlu1 %239  ;;  %v233_v0 = vpop.permute.xlu0 %232 }
 0x115   :  { %v284_v48 = vmul.f32 %v3383_v46, %v240_v45  ;;  %v283_v49 = vmul.f32 %v3382_v47, %v233_v0  ;;  %v4002_v0 = vld [vmem:[#allocation8 + $0xd0] ss:$8 sps:$4 sm:$0xff]  }
 0x116   :  { %1304 = vmatpush1.bf16.msra.mxu1 %v4002_v0  ;;  %v402_v0 = vld [vmem:[#allocation7 + $0x1f8] sm:$0xff] }
 0x117   :  { %v297_v51 = vrot.slane %v284_v48, 4  ;;  %v291_v52 = vrot.slane %v283_v49, 4 }
 0x118   :  { %v247_v55 = vpop.permute.xlu1 %246  ;;  %v181_v56 = vpop.permute.xlu0 %180 }
 0x119   :  { %v298_v57 = vadd.f32 %v297_v51, %v284_v48  ;;  %v285_v58 = vmul.f32 %v3384_v54, %v247_v55  ;;  %v292_v59 = vadd.f32 %v291_v52, %v283_v49  ;;  %vm207_vm5 = vcmp.eq.s32.totalorder %v181_v56, %v4872_v38  ;;  %v4006_v52 = vld [vmem:[#allocation8 + $0xe4] ss:$8 sps:$4 sm:$0xff]  }
 0x11a   :  { %v3386_v20 = vsel %vm207_vm5, 1.0, %v4657_v1  ;;  %1305 = vmatprep.subr.bf16.mxu1 %v4006_v52 }
 0x11b   :  { %v303_v61 = vrot.slane %v285_v58, 4  ;;  %v299_v2 = vrot.slane %v298_v57, 2  ;;  %v293_v11 = vrot.slane %v292_v59, 2  ;;  %1306 = vmatpush1.bf16.msra.mxu1 %v4008_v60  ;;  %v426_v60 = vld [vmem:[#allocation7 + $0x2b8] sm:$0xff] }
 0x11c   :  { %v254_v8 = vpop.permute.xlu1 %253  ;;  %v188_v9 = vpop.permute.xlu0 %187 }
 0x11d   :  { %v286_v10 = vmul.f32 %v3385_v63, %v254_v8  ;;  %v304_v13 = vadd.f32 %v303_v61, %v285_v58  ;;  %v300_v18 = vadd.f32 %v299_v2, %v298_v57  ;;  %vm208_vm6 = vcmp.eq.s32.totalorder %v188_v9, %v4872_v38 }
 0x11e   :  { %v294_v21 = vadd.f32 %v293_v11, %v292_v59  ;;  %v3387_v29 = vsel %vm208_vm6, 1.0, %v4657_v1 }
 0x11f   :  { %v309_v15 = vrot.slane %v286_v10, 4  ;;  %v305_v24 = vrot.slane %v304_v13, 2  ;;  %v301_v31 = vrot.slane %v300_v18, 1 }
 0x120   :  { %v261_v17 = vpop.permute.xlu1 %260  ;;  %v195_v7 = vpop.permute.xlu0 %194  ;;  %v295_v33 = vrot.slane %v294_v21, 1 }
 0x121   :  { %v310_v19 = vadd.f32 %v309_v15, %v286_v10  ;;  %v287_v22 = vmul.f32 %v3386_v20, %v261_v17  ;;  %vm209_vm7 = vcmp.eq.s32.totalorder %v195_v7, %v4872_v38  ;;  %v306_v35 = vadd.f32 %v305_v24, %v304_v13  ;;  %v347_v13 = vld [vmem:[#allocation7 + $0x40] sm:$0xff]  ;;  %v354_v17 = vld [vmem:[#allocation7 + $0x78] sm:$0xff]  ;;  %v360_v7 = vld [vmem:[#allocation7 + $0xa8] sm:$0xff] }
 0x122   :  { %v3388_v37 = vsel %vm209_vm7, 1.0, %v4657_v1  ;;  %v302_v58 = vadd.f32 %v301_v31, %v300_v18  ;;  %v296_v59 = vadd.f32 %v295_v33, %v294_v21 }
 0x123   :  { %v311_v26 = vrot.slane %v310_v19, 2  ;;  %v315_v27 = vrot.slane %v287_v22, 4  ;;  %v307_v48 = vrot.slane %v306_v35, 1 }
 0x124   :  { %v268_v28 = vpop.permute.xlu1 %267  ;;  %v202_v30 = vpop.permute.xlu0 %201  ;;  %v444_v15 = vsel %vm443_vm9, %v302_v58, %v296_v59  ;;  %v413_v58 = vld [vmem:[#allocation7 + $0x250] sm:$0xff]  ;;  %v419_v59 = vld [vmem:[#allocation7 + $0x280] sm:$0xff] }
 0x125   :  { %v288_v32 = vmul.f32 %v3387_v29, %v268_v28  ;;  %vm210_vm8 = vcmp.eq.s32.totalorder %v202_v30, %v4872_v38  ;;  %v316_v34 = vadd.f32 %v315_v27, %v287_v22  ;;  %v312_v40 = vadd.f32 %v311_v26, %v310_v19  ;;  %v359_v26 = vld [vmem:[#allocation7 + $0xa0] sm:$0xff]  ;;  %v366_v29 = vld [vmem:[#allocation7 + $0xd8] sm:$0xff]  ;;  %v372_v30 = vld [vmem:[#allocation7 + $0x108] sm:$0xff] }
 0x126   :  { %v3389_v43 = vsel %vm210_vm8, 1.0, %v4657_v1  ;;  %v308_v61 = vadd.f32 %v307_v48, %v306_v35  ;;  %v3833_v28 = vpack.c.bf16 %v347_v13, %v341_v12  ;;  %v3837_v35 = vpack.c.bf16 %v359_v26, %v353_v25  ;;  %v408_v48 = vld [vmem:[#allocation7 + $0x228] sm:$0xff]  ;;  %v343_v13 = vld [vmem:[#allocation7 + $0x20] sm:$0xff]  ;;  %v373_v26 = vld [vmem:[#allocation7 + $0x110] sm:$0xff] }
 0x127   :  { %v321_v36 = vrot.slane %v288_v32, 4  ;;  %v317_v41 = vrot.slane %v316_v34, 2  ;;  %v313_v53 = vrot.slane %v312_v40, 1  ;;  %v3839_v39 = vpack.c.bf16 %v372_v30, %v366_v29  ;;  %v367_v25 = vld [vmem:[#allocation7 + $0xe0] sm:$0xff] }
 0x128   :  { %v282_v42 = vpop.permute.xlu1 %281  ;;  %v275_v44 = vpop.permute.xlu0 %274  ;;  %v446_v18 = vsel %vm445_vm10, %v308_v61, %v444_v15  ;;  %v432_v61 = vld [vmem:[#allocation7 + $0x2e8] sm:$0xff]  ;;  %v349_v15 = vld [vmem:[#allocation7 + $0x50] sm:$0xff]  ;;  %v3873_v29 = vpack.c.bf16 %v373_v26, %v367_v25 }
 0x129   :  { %v322_v45 = vadd.f32 %v321_v36, %v288_v32  ;;  %v290_v38 = vmul.f32 %v3389_v43, %v282_v42  ;;  %v289_v46 = vmul.f32 %v3388_v37, %v275_v44  ;;  %v318_v47 = vadd.f32 %v317_v41, %v316_v34  ;;  %v365_v34 = vld [vmem:[#allocation7 + $0xd0] sm:$0xff]  ;;  %v378_v36 = vld [vmem:[#allocation7 + $0x138] sm:$0xff]  ;;  %v384_v37 = vld [vmem:[#allocation7 + $0x168] sm:$0xff] }
 0x12a   :  { %v314_v9 = vadd.f32 %v313_v53, %v312_v40  ;;  %v3835_v32 = vpack.c.bf16 %v360_v7, %v354_v17  ;;  %v377_v40 = vld [vmem:[#allocation7 + $0x130] sm:$0xff]  ;;  %v383_v41 = vld [vmem:[#allocation7 + $0x160] sm:$0xff]  ;;  %v3841_v42 = vpack.c.bf16 %v371_v14, %v365_v34  ;;  %v390_v43 = vld [vmem:[#allocation7 + $0x198] sm:$0xff]  ;;  %v3865_v7 = vpack.c.bf16 %v349_v15, %v343_v13 }
 0x12b   :  { %v323_v49 = vrot.slane %v322_v45, 2  ;;  %v333_v50 = vrot.slane %v290_v38, 4  ;;  %v327_v51 = vrot.slane %v289_v46, 4  ;;  %v319_v54 = vrot.slane %v318_v47, 1  ;;  %v396_v44 = vld [vmem:[#allocation7 + $0x1c8] sm:$0xff]  ;;  %v414_v53 = vld [vmem:[#allocation7 + $0x258] sm:$0xff] }
 0x12c   :  { %v448_v21 = vsel %vm447_vm11, %v314_v9, %v446_v18  ;;  %v431_v9 = vld [vmem:[#allocation7 + $0x2e0] sm:$0xff]  ;;  %v362_v17 = vld [vmem:[#allocation7 + $0xb8] sm:$0xff]  ;;  %v392_v34 = vld [vmem:[#allocation7 + $0x1a8] sm:$0xff] }
 0x12d   :  { %v324_v55 = vadd.f32 %v323_v49, %v322_v45  ;;  %v334_v56 = vadd.f32 %v333_v50, %v290_v38  ;;  %v328_v57 = vadd.f32 %v327_v51, %v289_v46  ;;  %v320_v2 = vadd.f32 %v319_v54, %v318_v47  ;;  %v389_v38 = vld [vmem:[#allocation7 + $0x190] sm:$0xff]  ;;  %v395_v46 = vld [vmem:[#allocation7 + $0x1c0] sm:$0xff]  ;;  %v420_v54 = vld [vmem:[#allocation7 + $0x288] sm:$0xff] }
 0x12e   :  { %v3843_v45 = vpack.c.bf16 %v384_v37, %v378_v36  ;;  %v3845_v47 = vpack.c.bf16 %v383_v41, %v377_v40  ;;  %v3847_v49 = vpack.c.bf16 %v396_v44, %v390_v43  ;;  %v401_v50 = vld [vmem:[#allocation7 + $0x1f0] sm:$0xff]  ;;  %v407_v51 = vld [vmem:[#allocation7 + $0x220] sm:$0xff]  ;;  %v3849_v52 = vpack.c.bf16 %v395_v46, %v389_v38  ;;  %v398_v14 = vld [vmem:[#allocation7 + $0x1d8] sm:$0xff] }
 0x12f   :  { %v325_v62 = vrot.slane %v324_v55, 1  ;;  %v335_v63 = vrot.slane %v334_v56, 2  ;;  %v329_v8 = vrot.slane %v328_v57, 2  ;;  %v450_v24 = vsel %vm449_vm12, %v320_v2, %v448_v21  ;;  %v344_v2 = vld [vmem:[#allocation7 + $0x28] sm:$0xff]  ;;  %v391_v37 = vld [vmem:[#allocation7 + $0x1a0] sm:$0xff]  ;;  %v410_v40 = vld [vmem:[#allocation7 + $0x238] sm:$0xff] }
 0x130   :  { %v368_v21 = vld [vmem:[#allocation7 + $0xe8] sm:$0xff]  ;;  %v3879_v36 = vpack.c.bf16 %v398_v14, %v392_v34  ;;  %v403_v43 = vld [vmem:[#allocation7 + $0x200] sm:$0xff]  ;;  %v409_v44 = vld [vmem:[#allocation7 + $0x230] sm:$0xff] }
 0x131   :  { %v336_v10 = vadd.f32 %v335_v63, %v334_v56  ;;  %v330_v11 = vadd.f32 %v329_v8, %v328_v57  ;;  %v326_v16 = vadd.f32 %v325_v62, %v324_v55  ;;  %v3851_v55 = vpack.c.bf16 %v408_v48, %v402_v0  ;;  %v425_v8 = vld [vmem:[#allocation7 + $0x2b0] sm:$0xff]  ;;  %v422_v38 = vld [vmem:[#allocation7 + $0x298] sm:$0xff]  ;;  %v415_v0 = vld [vmem:[#allocation7 + $0x260] sm:$0xff] }
 0x132   :  { %v3853_v56 = vpack.c.bf16 %v407_v51, %v401_v50  ;;  %v3855_v57 = vpack.c.bf16 %v420_v54, %v414_v53  ;;  %v3857_v62 = vpack.c.bf16 %v419_v59, %v413_v58  ;;  %v3859_v63 = vpack.c.bf16 %v432_v61, %v426_v60  ;;  %v421_v48 = vld [vmem:[#allocation7 + $0x290] sm:$0xff]  ;;  %v434_v50 = vld [vmem:[#allocation7 + $0x2f8] sm:$0xff]  ;;  %v427_v53 = vld [vmem:[#allocation7 + $0x2c0] sm:$0xff] }
 0x133   :  { %v337_v19 = vrot.slane %v336_v10, 1  ;;  %v331_v20 = vrot.slane %v330_v11, 1  ;;  %v452_v27 = vsel %vm451_vm13, %v326_v16, %v450_v24  ;;  %v356_v16 = vld [vmem:[#allocation7 + $0x88] sm:$0xff]  ;;  %v3885_v46 = vpack.c.bf16 %v409_v44, %v403_v43  ;;  %v433_v54 = vld [vmem:[#allocation7 + $0x2f0] sm:$0xff] }
 0x134   :  { %v3867_v18 = vpack.c.bf16 %v362_v17, %v356_v16  ;;  %v3889_v51 = vpack.c.bf16 %v421_v48, %v415_v0  ;;  %v3975_v58 = vld [vmem:[#allocation11 + $0x24] ss:$16 sps:$4 sm:$0xff]   ;;  %v3973_v59 = vld [vmem:[#allocation11 + $0x20] ss:$16 sps:$4 sm:$0xff]  }
 0x135   :  { %v332_v22 = vadd.f32 %v331_v20, %v330_v11  ;;  %v338_v23 = vadd.f32 %v337_v19, %v336_v10  ;;  %v350_v10 = vld [vmem:[#allocation7 + $0x58] sm:$0xff]  ;;  %v3861_v11 = vpack.c.bf16 %v431_v9, %v425_v8  ;;  %v355_v19 = vld [vmem:[#allocation7 + $0x80] sm:$0xff]  ;;  %v361_v20 = vld [vmem:[#allocation7 + $0xb0] sm:$0xff] }
 0x136   :  { %v3863_v12 = vpack.c.bf16 %v350_v10, %v344_v2  ;;  %v3981_v60 = vld [vmem:[#allocation11 + $0x44] ss:$16 sps:$4 sm:$0xff]   ;;  %v3979_v61 = vld [vmem:[#allocation11 + $0x40] ss:$16 sps:$4 sm:$0xff]  }
 0x137   :  { %v454_v31 = vsel %vm453_vm14, %v332_v22, %v452_v27  ;;  %v374_v22 = vld [vmem:[#allocation7 + $0x118] sm:$0xff]  ;;  %v380_v27 = vld [vmem:[#allocation7 + $0x148] sm:$0xff] }
 0x138   :  { %v4897_v33 = vsel %vm455_vm15, %v338_v23, %v454_v31  ;;  %v3869_v23 = vpack.c.bf16 %v361_v20, %v355_v19  ;;  %v3871_v24 = vpack.c.bf16 %v374_v22, %v368_v21  ;;  %v379_v31 = vld [vmem:[#allocation7 + $0x140] sm:$0xff]  ;;  %v3993_v8 = vld [vmem:[#allocation11 + $0x84] ss:$16 sps:$4 sm:$0xff]   ;;  %v3991_v9 = vld [vmem:[#allocation11 + $0x80] ss:$16 sps:$4 sm:$0xff]  }
 0x139   :  { %523 = vmatmul.mubr.f32.vlgmr.msra.gmra.mrb[0].mxu0 %v4897_v33  ;;  %v3999_v2 = vld [vmem:[#allocation11 + $0xa4] ss:$16 sps:$4 sm:$0xff]   ;;  %v3997_v10 = vld [vmem:[#allocation11 + $0xa0] ss:$16 sps:$4 sm:$0xff]  }
 0x13a   :  { %3834 = vmatpush1.bf16.msra.mxu0 %v3833_v28  ;;  %593 = vmatprep.mubr.f32.mxu0 %v4657_v1  ;;  %v386_v28 = vld [vmem:[#allocation7 + $0x178] sm:$0xff]  ;;  %v4020_v17 = vld [vmem:[#allocation8 + $0x104] ss:$8 sps:$4 sm:$0xff]  }
 0x13b   :  { %3836 = vmatprep.subr.bf16.mxu0 %v3835_v32  ;;  %v3875_v30 = vpack.c.bf16 %v386_v28, %v380_v27  ;;  %v385_v32 = vld [vmem:[#allocation7 + $0x170] sm:$0xff]  ;;  %v4011_v13 = vld [vmem:[#allocation11 + $0xe4] ss:$16 sps:$4 sm:$0xff]   ;;  %v4009_v16 = vld [vmem:[#allocation11 + $0xe0] ss:$16 sps:$4 sm:$0xff]  }
 0x13c   :  { %v4014_v15 = vld [vmem:[#allocation8 + $0xf0] ss:$8 sps:$4 sm:$0xff]   ;;  %v4023_v19 = vld [vmem:[#allocation11 + $0x124] ss:$16 sps:$4 sm:$0xff]  }
 0x13d   :  { %v4021_v20 = vld [vmem:[#allocation11 + $0x120] ss:$16 sps:$4 sm:$0xff]   ;;  %v4029_v21 = vld [vmem:[#allocation11 + $0x144] ss:$16 sps:$4 sm:$0xff]  }
 0x13e   :  { %3838 = vmatpush1.bf16.msra.mxu0 %v3837_v35  ;;  %v3877_v35 = vpack.c.bf16 %v385_v32, %v379_v31  ;;  %v4027_v22 = vld [vmem:[#allocation11 + $0x140] ss:$16 sps:$4 sm:$0xff]   ;;  %v4041_v25 = vld [vmem:[#allocation11 + $0x184] ss:$16 sps:$4 sm:$0xff]   ;;  %v1400_v32 = vld [vmem:[#allocation10] sm:$0xff] }
 0x13f   :  { %3840 = vmatprep.subr.bf16.mxu0 %v3839_v39  ;;  %v404_v39 = vld [vmem:[#allocation7 + $0x208] sm:$0xff]  ;;  %v4904_v34 = vcombine.high %v1400_v32, %v1400_v32 }
 0x140   :  { %v4039_v26 = vld [vmem:[#allocation11 + $0x180] ss:$16 sps:$4 sm:$0xff]   ;;  %v4047_v27 = vld [vmem:[#allocation11 + $0x1a4] ss:$16 sps:$4 sm:$0xff]  }
 0x141   :  { %v4045_v28 = vld [vmem:[#allocation11 + $0x1a0] ss:$16 sps:$4 sm:$0xff]   ;;  %v4059_v31 = vld [vmem:[#allocation11 + $0x1e4] ss:$16 sps:$4 sm:$0xff]  }
 0x142   :  { %3842 = vmatpush1.bf16.msra.mxu0 %v3841_v42  ;;  %v3883_v42 = vpack.c.bf16 %v410_v40, %v404_v39  ;;  %v4057_v14 = vld [vmem:[#allocation11 + $0x1e0] ss:$16 sps:$4 sm:$0xff]   ;;  %v4079_v40 = vld [vmem:[#allocation11 + $0x244] ss:$16 sps:$4 sm:$0xff]  }
 0x143   :  { %3844 = vmatprep.subr.bf16.mxu0 %v3843_v45  ;;  %v416_v45 = vld [vmem:[#allocation7 + $0x268] sm:$0xff] }
 0x144   :  { %v4071_v39 = vld [vmem:[#allocation11 + $0x220] ss:$16 sps:$4 sm:$0xff]   ;;  %v4091_v44 = vld [vmem:[#allocation11 + $0x284] ss:$16 sps:$4 sm:$0xff]  }
 0x145   :  { %v4083_v43 = vld [vmem:[#allocation11 + $0x260] ss:$16 sps:$4 sm:$0xff]   ;;  %v4109_v48 = vld [vmem:[#allocation11 + $0x2e4] ss:$16 sps:$4 sm:$0xff]  }
 0x146   :  { %3846 = vmatpush1.bf16.msra.mxu0 %v3845_v47  ;;  %v3887_v47 = vpack.c.bf16 %v422_v38, %v416_v45  ;;  %v4089_v45 = vld [vmem:[#allocation11 + $0x280] ss:$16 sps:$4 sm:$0xff]   ;;  %v4097_v38 = vld [vmem:[#allocation11 + $0x2a4] ss:$16 sps:$4 sm:$0xff]  }
 0x147   :  { %3848 = vmatprep.subr.bf16.mxu0 %v3847_v49  ;;  %v428_v49 = vld [vmem:[#allocation7 + $0x2c8] sm:$0xff] }
 0x148   :  { %v4101_v0 = vld [vmem:[#allocation11 + $0x2c0] ss:$16 sps:$4 sm:$0xff]  }
 0x14a   :  { %3850 = vmatpush1.bf16.msra.mxu0 %v3849_v52  ;;  %v3891_v52 = vpack.c.bf16 %v434_v50, %v428_v49  ;;  %v4107_v49 = vld [vmem:[#allocation11 + $0x2e0] ss:$16 sps:$4 sm:$0xff]   ;;  %v4115_v50 = vld [vmem:[#allocation11 + $0x304] ss:$16 sps:$4 sm:$0xff]  }
 0x14b   :  { %3852 = vmatprep.subr.bf16.mxu0 %v3851_v55  ;;  %v3893_v55 = vpack.c.bf16 %v433_v54, %v427_v53  ;;  %v4119_v53 = vld [vmem:[#allocation11 + $0x320] ss:$16 sps:$4 sm:$0xff]   ;;  %v4127_v54 = vld [vmem:[#allocation11 + $0x344] ss:$16 sps:$4 sm:$0xff]  }
 0x14e   :  { %3854 = vmatpush1.bf16.msra.mxu0 %v3853_v56  ;;  %v3969_v56 = vld [vmem:[#allocation11 + $0x4] ss:$16 sps:$4 sm:$0xff]  }
 0x14f   :  { %3856 = vmatprep.subr.bf16.mxu0 %v3855_v57  ;;  %v3967_v57 = vld [vmem:[#allocation11] ss:$16 sps:$4 sm:$0xff]  }
 0x152   :  { %3858 = vmatpush1.bf16.msra.mxu0 %v3857_v62  ;;  %v3987_v62 = vld [vmem:[#allocation11 + $0x64] ss:$16 sps:$4 sm:$0xff]  }
 0x153   :  { %3860 = vmatprep.subr.bf16.mxu0 %v3859_v63  ;;  %v3985_v63 = vld [vmem:[#allocation11 + $0x60] ss:$16 sps:$4 sm:$0xff]  }
 0x156   :  { %3862 = vmatpush1.bf16.msra.mxu0 %v3861_v11  ;;  %v4003_v11 = vld [vmem:[#allocation11 + $0xc0] ss:$16 sps:$4 sm:$0xff]  }
 0x157   :  { %3864 = vmatprep.subr.bf16.mxu0 %v3863_v12  ;;  %v4012_v12 = vld [vmem:[#allocation8 + $0xf4] ss:$8 sps:$4 sm:$0xff]  }
 0x158   :  { %1307 = vmatprep.subr.bf16.mxu1 %v4012_v12  ;;  %v4163_v12 = vld [vmem:[#allocation11 + $0x400] ss:$16 sps:$4 sm:$0xff]  }
 0x159   :  { %594 = vmatmul.mubr.f32.vlgmr.msra.gmra.mrb[2].mxu0 %v4897_v33  ;;  %1308 = vmatpush1.bf16.msra.mxu1 %v4014_v15 }
 0x15a   :  { %3866 = vmatpush1.bf16.msra.mxu0 %v3865_v7  ;;  %664 = vmatprep.mubr.f32.mxu0 %v4657_v1  ;;  %v397_v1 = vld [vmem:[#allocation7 + $0x1d0] sm:$0xff]  ;;  %v4017_v7 = vld [vmem:[#allocation11 + $0x104] ss:$16 sps:$4 sm:$0xff]  }
 0x15b   :  { %3868 = vmatprep.subr.bf16.mxu0 %v3867_v18  ;;  %v3881_v41 = vpack.c.bf16 %v397_v1, %v391_v37  ;;  %1318 = vmatprep.subr.bf16.mxu1 %v4020_v17  ;;  %v4015_v18 = vld [vmem:[#allocation11 + $0x100] ss:$16 sps:$4 sm:$0xff]   ;;  %v4073_v1 = vld [vmem:[#allocation11 + $0x224] ss:$16 sps:$4 sm:$0xff]  }
 0x15c   :  { %v4065_v37 = vld [vmem:[#allocation11 + $0x200] ss:$16 sps:$4 sm:$0xff]   ;;  %v4177_v17 = vld [vmem:[#allocation11 + $0x444] ss:$16 sps:$4 sm:$0xff]  }
 0x15e   :  { %3870 = vmatpush1.bf16.msra.mxu0 %v3869_v23  ;;  %v4035_v23 = vld [vmem:[#allocation11 + $0x164] ss:$16 sps:$4 sm:$0xff]  }
 0x15f   :  { %3872 = vmatprep.subr.bf16.mxu0 %v3871_v24  ;;  %v4033_v24 = vld [vmem:[#allocation11 + $0x160] ss:$16 sps:$4 sm:$0xff]  }
 0x162   :  { %3874 = vmatpush1.bf16.msra.mxu0 %v3873_v29  ;;  %v4053_v29 = vld [vmem:[#allocation11 + $0x1c4] ss:$16 sps:$4 sm:$0xff]   ;;  %v674_v15 = vpop.xlane.xlu0 %673 }
 0x163   :  { %3876 = vmatprep.subr.bf16.mxu0 %v3875_v30  ;;  %v4051_v30 = vld [vmem:[#allocation11 + $0x1c0] ss:$16 sps:$4 sm:$0xff]  }
 0x166   :  { %3878 = vmatpush1.bf16.msra.mxu0 %v3877_v35  ;;  %v4067_v35 = vld [vmem:[#allocation11 + $0x204] ss:$16 sps:$4 sm:$0xff]  }
 0x167   :  { %3880 = vmatprep.subr.bf16.mxu0 %v3879_v36  ;;  %v4907_v36 = vcombine.low %v1400_v32, %v1400_v32  ;;  %v4207_v32 = vld [vmem:[#allocation11 + $0x4e4] ss:$16 sps:$4 sm:$0xff]  }
 0x16a   :  { %3882 = vmatpush1.bf16.msra.mxu0 %v3881_v41  ;;  %v4077_v41 = vld [vmem:[#allocation11 + $0x240] ss:$16 sps:$4 sm:$0xff]  }
 0x16b   :  { %3884 = vmatprep.subr.bf16.mxu0 %v3883_v42  ;;  %v4085_v42 = vld [vmem:[#allocation11 + $0x264] ss:$16 sps:$4 sm:$0xff]  }
 0x16e   :  { %3886 = vmatpush1.bf16.msra.mxu0 %v3885_v46  ;;  %v4095_v46 = vld [vmem:[#allocation11 + $0x2a0] ss:$16 sps:$4 sm:$0xff]  }
 0x16f   :  { %3888 = vmatprep.subr.bf16.mxu0 %v3887_v47  ;;  %v4103_v47 = vld [vmem:[#allocation11 + $0x2c4] ss:$16 sps:$4 sm:$0xff]  }
 0x172   :  { %3890 = vmatpush1.bf16.msra.mxu0 %v3889_v51  ;;  %v4113_v51 = vld [vmem:[#allocation11 + $0x300] ss:$16 sps:$4 sm:$0xff]  }
 0x173   :  { %3892 = vmatprep.subr.bf16.mxu0 %v3891_v52  ;;  %v4121_v52 = vld [vmem:[#allocation11 + $0x324] ss:$16 sps:$4 sm:$0xff]  }
 0x176   :  { %3894 = vmatpush1.bf16.msra.mxu0 %v3893_v55  ;;  %v4125_v55 = vld [vmem:[#allocation11 + $0x340] ss:$16 sps:$4 sm:$0xff]  }
 0x177   :  { %2598 = vmatprep.subr.bf16.mxu0 %v3969_v56  ;;  %v4133_v56 = vld [vmem:[#allocation11 + $0x364] ss:$16 sps:$4 sm:$0xff]  }
 0x179   :  { %665 = vmatmul.mubr.f32.vlgmr.msra.gmra.mrb[4].mxu0 %v4897_v33  ;;  %v4005_v33 = vld [vmem:[#allocation11 + $0xc4] ss:$16 sps:$4 sm:$0xff]  }
 0x17a   :  { %2599 = vmatpush1.bf16.msra.mxu0 %v3967_v57  ;;  %2630 = vmatprep.mubr.bf16.mxu0 %v4904_v34  ;;  %v4131_v57 = vld [vmem:[#allocation11 + $0x360] ss:$16 sps:$4 sm:$0xff]  }
 0x17b   :  { %2600 = vmatprep.subr.bf16.mxu0 %v3975_v58  ;;  %v4139_v58 = vld [vmem:[#allocation11 + $0x384] ss:$16 sps:$4 sm:$0xff]  }
 0x17e   :  { %2601 = vmatpush1.bf16.msra.mxu0 %v3973_v59  ;;  %v4137_v59 = vld [vmem:[#allocation11 + $0x380] ss:$16 sps:$4 sm:$0xff]  }
 0x17f   :  { %2602 = vmatprep.subr.bf16.mxu0 %v3981_v60  ;;  %v4145_v60 = vld [vmem:[#allocation11 + $0x3a4] ss:$16 sps:$4 sm:$0xff]  }
 0x182   :  { %2603 = vmatpush1.bf16.msra.mxu0 %v3979_v61  ;;  %v4143_v61 = vld [vmem:[#allocation11 + $0x3a0] ss:$16 sps:$4 sm:$0xff]  }
 0x183   :  { %2604 = vmatprep.subr.bf16.mxu0 %v3987_v62  ;;  %v4151_v62 = vld [vmem:[#allocation11 + $0x3c4] ss:$16 sps:$4 sm:$0xff]  }
 0x186   :  { %2605 = vmatpush1.bf16.msra.mxu0 %v3985_v63  ;;  %v4149_v63 = vld [vmem:[#allocation11 + $0x3c0] ss:$16 sps:$4 sm:$0xff]  }
 0x187   :  { %2606 = vmatprep.subr.bf16.mxu0 %v3993_v8  ;;  %v4157_v8 = vld [vmem:[#allocation11 + $0x3e4] ss:$16 sps:$4 sm:$0xff]  }
 0x18a   :  { %2607 = vmatpush1.bf16.msra.mxu0 %v3991_v9  ;;  %v1401_v9 = vld [vmem:[#allocation10 + $0x8] sm:$0xff] }
 0x18b   :  { %2608 = vmatprep.subr.bf16.mxu0 %v3999_v2  ;;  %v4910_v2 = vcombine.high %v1401_v9, %v1401_v9 }
 0x18e   :  { %2609 = vmatpush1.bf16.msra.mxu0 %v3997_v10  ;;  %v4155_v10 = vld [vmem:[#allocation11 + $0x3e0] ss:$16 sps:$4 sm:$0xff]  }
 0x18f   :  { %2610 = vmatprep.subr.bf16.mxu0 %v4005_v33  ;;  %v4165_v33 = vld [vmem:[#allocation11 + $0x404] ss:$16 sps:$4 sm:$0xff]  }
 0x192   :  { %2611 = vmatpush1.bf16.msra.mxu0 %v4003_v11  ;;  %v4913_v11 = vcombine.low %v1401_v9, %v1401_v9 }
 0x193   :  { %2612 = vmatprep.subr.bf16.mxu0 %v4011_v13  ;;  %v4171_v13 = vld [vmem:[#allocation11 + $0x424] ss:$16 sps:$4 sm:$0xff]  }
 0x196   :  { %2613 = vmatpush1.bf16.msra.mxu0 %v4009_v16  ;;  %v4169_v16 = vld [vmem:[#allocation11 + $0x420] ss:$16 sps:$4 sm:$0xff]  }
 0x197   :  { %2614 = vmatprep.subr.bf16.mxu0 %v4017_v7  ;;  %v675_v7 = vmax.f32 %v674_v15, 1.0  ;;  %v1402_v15 = vld [vmem:[#allocation10 + $0x10] sm:$0xff] }
 0x199   :  { %4429 = vrcp.f32 %v675_v7  ;;  %v4921_v7 = vcombine.high %v1402_v15, %v1402_v15 }
 0x19a   :  { %2615 = vmatpush1.bf16.msra.mxu0 %v4015_v18  ;;  %v4175_v18 = vld [vmem:[#allocation11 + $0x440] ss:$16 sps:$4 sm:$0xff]  }
 0x19b   :  { %2616 = vmatprep.subr.bf16.mxu0 %v4023_v19  ;;  %v4183_v19 = vld [vmem:[#allocation11 + $0x464] ss:$16 sps:$4 sm:$0xff]  }
 0x19e   :  { %2617 = vmatpush1.bf16.msra.mxu0 %v4021_v20  ;;  %v4181_v20 = vld [vmem:[#allocation11 + $0x460] ss:$16 sps:$4 sm:$0xff]  }
 0x19f   :  { %2618 = vmatprep.subr.bf16.mxu0 %v4029_v21  ;;  %v4189_v21 = vld [vmem:[#allocation11 + $0x484] ss:$16 sps:$4 sm:$0xff]  }
 0x1a2   :  { %2619 = vmatpush1.bf16.msra.mxu0 %v4027_v22  ;;  %v4187_v22 = vld [vmem:[#allocation11 + $0x480] ss:$16 sps:$4 sm:$0xff]  }
 0x1a3   :  { %2620 = vmatprep.subr.bf16.mxu0 %v4035_v23  ;;  %v4195_v23 = vld [vmem:[#allocation11 + $0x4a4] ss:$16 sps:$4 sm:$0xff]  }
 0x1a6   :  { %2621 = vmatpush1.bf16.msra.mxu0 %v4033_v24  ;;  %v4916_v24 = vpop.eup %4429 }
 0x1a7   :  { %2622 = vmatprep.subr.bf16.mxu0 %v4041_v25  ;;  %v4193_v25 = vld [vmem:[#allocation11 + $0x4a0] ss:$16 sps:$4 sm:$0xff]  }
 0x1aa   :  { %2623 = vmatpush1.bf16.msra.mxu0 %v4039_v26  ;;  %v4201_v26 = vld [vmem:[#allocation11 + $0x4c4] ss:$16 sps:$4 sm:$0xff]  }
 0x1ab   :  { %2624 = vmatprep.subr.bf16.mxu0 %v4047_v27 }
 0x1ae   :  { %2625 = vmatpush1.bf16.msra.mxu0 %v4045_v28 }
 0x1af   :  { %2626 = vmatprep.subr.bf16.mxu0 %v4053_v29 }
 0x1b2   :  { %2627 = vmatpush1.bf16.msra.mxu0 %v4051_v30 }
 0x1b3   :  { %2628 = vmatprep.subr.bf16.mxu0 %v4059_v31  ;;  %v4199_v31 = vld [vmem:[#allocation11 + $0x4c0] ss:$16 sps:$4 sm:$0xff]  }
 0x1b6   :  { %2629 = vmatpush1.bf16.msra.mxu0 %v4057_v14 }
 0x1b7   :  { %2639 = vmatprep.subr.bf16.mxu0 %v4067_v35  ;;  %v4018_v35 = vld [vmem:[#allocation8 + $0x100] ss:$8 sps:$4 sm:$0xff]  }
 0x1b9   :  { %2631 = vmatmul.mubr.bf16.vlgmr.msra.gmra.mrb[8].mxu0 %v4907_v36 }
 0x1ba   :  { %2640 = vmatpush1.bf16.msra.mxu0 %v4065_v37  ;;  %2671 = vmatprep.mubr.bf16.mxu0 %v4910_v2 }
 0x1bb   :  { %2641 = vmatprep.subr.bf16.mxu0 %v4073_v1  ;;  %v4026_v1 = vld [vmem:[#allocation8 + $0x114] ss:$8 sps:$4 sm:$0xff]  }
 0x1be   :  { %2642 = vmatpush1.bf16.msra.mxu0 %v4071_v39  ;;  %v4205_v39 = vld [vmem:[#allocation11 + $0x4e0] ss:$16 sps:$4 sm:$0xff]  }
 0x1bf   :  { %2643 = vmatprep.subr.bf16.mxu0 %v4079_v40  ;;  %v4213_v40 = vld [vmem:[#allocation11 + $0x504] ss:$16 sps:$4 sm:$0xff]  }
 0x1c2   :  { %2644 = vmatpush1.bf16.msra.mxu0 %v4077_v41  ;;  %v4024_v41 = vld [vmem:[#allocation8 + $0x110] ss:$8 sps:$4 sm:$0xff]  }
 0x1c3   :  { %2645 = vmatprep.subr.bf16.mxu0 %v4085_v42  ;;  %v4032_v42 = vld [vmem:[#allocation8 + $0x124] ss:$8 sps:$4 sm:$0xff]  }
 0x1c6   :  { %2646 = vmatpush1.bf16.msra.mxu0 %v4083_v43  ;;  %v4211_v43 = vld [vmem:[#allocation11 + $0x500] ss:$16 sps:$4 sm:$0xff]  }
 0x1c7   :  { %2647 = vmatprep.subr.bf16.mxu0 %v4091_v44  ;;  %v4219_v44 = vld [vmem:[#allocation11 + $0x524] ss:$16 sps:$4 sm:$0xff]  }
 0x1ca   :  { %2648 = vmatpush1.bf16.msra.mxu0 %v4089_v45  ;;  %v4030_v45 = vld [vmem:[#allocation8 + $0x120] ss:$8 sps:$4 sm:$0xff]  }
 0x1cb   :  { %2649 = vmatprep.subr.bf16.mxu0 %v4097_v38  ;;  %v4038_v38 = vld [vmem:[#allocation8 + $0x134] ss:$8 sps:$4 sm:$0xff]  }
 0x1ce   :  { %2650 = vmatpush1.bf16.msra.mxu0 %v4095_v46  ;;  %v4217_v46 = vld [vmem:[#allocation11 + $0x520] ss:$16 sps:$4 sm:$0xff]  }
 0x1cf   :  { %2651 = vmatprep.subr.bf16.mxu0 %v4103_v47  ;;  %v4225_v47 = vld [vmem:[#allocation11 + $0x544] ss:$16 sps:$4 sm:$0xff]  }
 0x1d2   :  { %2652 = vmatpush1.bf16.msra.mxu0 %v4101_v0  ;;  %v4036_v0 = vld [vmem:[#allocation8 + $0x130] ss:$8 sps:$4 sm:$0xff]  }
 0x1d3   :  { %2653 = vmatprep.subr.bf16.mxu0 %v4109_v48  ;;  %v4044_v48 = vld [vmem:[#allocation8 + $0x144] ss:$8 sps:$4 sm:$0xff]  }
 0x1d6   :  { %2654 = vmatpush1.bf16.msra.mxu0 %v4107_v49  ;;  %v4223_v49 = vld [vmem:[#allocation11 + $0x540] ss:$16 sps:$4 sm:$0xff]  }
 0x1d7   :  { %2655 = vmatprep.subr.bf16.mxu0 %v4115_v50  ;;  %v4231_v50 = vld [vmem:[#allocation11 + $0x564] ss:$16 sps:$4 sm:$0xff]  }
 0x1da   :  { %2656 = vmatpush1.bf16.msra.mxu0 %v4113_v51  ;;  %v4042_v51 = vld [vmem:[#allocation8 + $0x140] ss:$8 sps:$4 sm:$0xff]  }
 0x1db   :  { %2657 = vmatprep.subr.bf16.mxu0 %v4121_v52  ;;  %v4050_v52 = vld [vmem:[#allocation8 + $0x154] ss:$8 sps:$4 sm:$0xff]  }
 0x1de   :  { %2658 = vmatpush1.bf16.msra.mxu0 %v4119_v53  ;;  %v4229_v53 = vld [vmem:[#allocation11 + $0x560] ss:$16 sps:$4 sm:$0xff]  }
 0x1df   :  { %2659 = vmatprep.subr.bf16.mxu0 %v4127_v54  ;;  %v4237_v54 = vld [vmem:[#allocation11 + $0x584] ss:$16 sps:$4 sm:$0xff]  }
 0x1e2   :  { %2660 = vmatpush1.bf16.msra.mxu0 %v4125_v55  ;;  %v4048_v55 = vld [vmem:[#allocation8 + $0x150] ss:$8 sps:$4 sm:$0xff]  }
 0x1e3   :  { %2661 = vmatprep.subr.bf16.mxu0 %v4133_v56  ;;  %v4056_v56 = vld [vmem:[#allocation8 + $0x164] ss:$8 sps:$4 sm:$0xff]  }
 0x1e6   :  { %2662 = vmatpush1.bf16.msra.mxu0 %v4131_v57  ;;  %v4235_v57 = vld [vmem:[#allocation11 + $0x580] ss:$16 sps:$4 sm:$0xff]  }
 0x1e7   :  { %2663 = vmatprep.subr.bf16.mxu0 %v4139_v58  ;;  %v4243_v58 = vld [vmem:[#allocation11 + $0x5a4] ss:$16 sps:$4 sm:$0xff]  }
 0x1ea   :  { %2664 = vmatpush1.bf16.msra.mxu0 %v4137_v59  ;;  %v4054_v59 = vld [vmem:[#allocation8 + $0x160] ss:$8 sps:$4 sm:$0xff]  }
 0x1eb   :  { %2665 = vmatprep.subr.bf16.mxu0 %v4145_v60  ;;  %v4062_v60 = vld [vmem:[#allocation8 + $0x174] ss:$8 sps:$4 sm:$0xff]  }
 0x1ee   :  { %2666 = vmatpush1.bf16.msra.mxu0 %v4143_v61  ;;  %v4241_v61 = vld [vmem:[#allocation11 + $0x5a0] ss:$16 sps:$4 sm:$0xff]  }
 0x1ef   :  { %2667 = vmatprep.subr.bf16.mxu0 %v4151_v62  ;;  %v4249_v62 = vld [vmem:[#allocation11 + $0x5c4] ss:$16 sps:$4 sm:$0xff]  }
 0x1f2   :  { %2668 = vmatpush1.bf16.msra.mxu0 %v4149_v63 }
 0x1f3   :  { %2669 = vmatprep.subr.bf16.mxu0 %v4157_v8  ;;  %v4060_v8 = vld [vmem:[#allocation8 + $0x170] ss:$8 sps:$4 sm:$0xff]  }
 0x1f6   :  { %2670 = vmatpush1.bf16.msra.mxu0 %v4155_v10  ;;  %v4070_v10 = vld [vmem:[#allocation8 + $0x184] ss:$8 sps:$4 sm:$0xff]  }
 0x1f7   :  { %2680 = vmatprep.subr.bf16.mxu0 %v4165_v33 }
 0x1f9   :  { %2672 = vmatmul.mubr.bf16.vlgmr.msra.gmra.mrb[8].mxu0 %v4913_v11 }
 0x1fa   :  { %2681 = vmatpush1.bf16.msra.mxu0 %v4163_v12  ;;  %v4247_v12 = vld [vmem:[#allocation11 + $0x5c0] ss:$16 sps:$4 sm:$0xff]   ;;  %2712 = vmatprep.mubr.bf16.mxu0 %v4921_v7 }
 0x1fb   :  { %2682 = vmatprep.subr.bf16.mxu0 %v4171_v13  ;;  %v4255_v13 = vld [vmem:[#allocation11 + $0x5e4] ss:$16 sps:$4 sm:$0xff]  }
 0x1fe   :  { %2683 = vmatpush1.bf16.msra.mxu0 %v4169_v16 }
 0x1ff   :  { %2684 = vmatprep.subr.bf16.mxu0 %v4177_v17  ;;  %v4068_v17 = vld [vmem:[#allocation8 + $0x180] ss:$8 sps:$4 sm:$0xff]  }
 0x202   :  { %2685 = vmatpush1.bf16.msra.mxu0 %v4175_v18  ;;  %v4076_v18 = vld [vmem:[#allocation8 + $0x194] ss:$8 sps:$4 sm:$0xff]  }
 0x203   :  { %2686 = vmatprep.subr.bf16.mxu0 %v4183_v19  ;;  %v4253_v19 = vld [vmem:[#allocation11 + $0x5e0] ss:$16 sps:$4 sm:$0xff]  }
 0x206   :  { %2687 = vmatpush1.bf16.msra.mxu0 %v4181_v20  ;;  %v4074_v20 = vld [vmem:[#allocation8 + $0x190] ss:$8 sps:$4 sm:$0xff]  }
 0x207   :  { %2688 = vmatprep.subr.bf16.mxu0 %v4189_v21  ;;  %v4082_v21 = vld [vmem:[#allocation8 + $0x1a4] ss:$8 sps:$4 sm:$0xff]  }
 0x20a   :  { %2689 = vmatpush1.bf16.msra.mxu0 %v4187_v22  ;;  %v4924_v22 = vcombine.low %v1402_v15, %v1402_v15  ;;  %v4202_v15 = vld [vmem:[#allocation8 + $0x2e0] ss:$8 sps:$4 sm:$0xff]  }
 0x20b   :  { %2690 = vmatprep.subr.bf16.mxu0 %v4195_v23  ;;  %v4080_v23 = vld [vmem:[#allocation8 + $0x1a0] ss:$8 sps:$4 sm:$0xff]  }
 0x20c   :  { %v524_v27 = vpop.f32.mrb[0].mxu0 }
 0x20d   :  { %v677_v28 = vmul.f32 %v4916_v24, %v524_v27  ;;  %v526_v29 = vpop.f32.mrb[1].mxu0  ;;  %v4094_v27 = vld [vmem:[#allocation8 + $0x1c4] ss:$8 sps:$4 sm:$0xff]  }
 0x20e   :  { %v678_v30 = vmul.f32 %v4916_v24, %v526_v29  ;;  %2691 = vmatpush1.bf16.msra.mxu0 %v4193_v25  ;;  %v4088_v25 = vld [vmem:[#allocation8 + $0x1b4] ss:$8 sps:$4 sm:$0xff]  }
 0x20f   :  { %2692 = vmatprep.subr.bf16.mxu0 %v4201_v26  ;;  %v683_v37 = vpack.c.bf16 %v677_v28, %v677_v28  ;;  %v4086_v26 = vld [vmem:[#allocation8 + $0x1b0] ss:$8 sps:$4 sm:$0xff]   ;;  %v4092_v28 = vld [vmem:[#allocation8 + $0x1c0] ss:$8 sps:$4 sm:$0xff]   ;;  %v4100_v29 = vld [vmem:[#allocation8 + $0x1d4] ss:$8 sps:$4 sm:$0xff]  }
 0x210   :  { %v684_v14 = vpack.c.bf16 %v678_v30, %v678_v30  ;;  %v4098_v30 = vld [vmem:[#allocation8 + $0x1d0] ss:$8 sps:$4 sm:$0xff]  }
 0x212   :  { %1309 = vmatprep.mubr.bf16.mxu1 %v684_v14  ;;  %2693 = vmatpush1.bf16.msra.mxu0 %v4199_v31  ;;  %v4106_v31 = vld [vmem:[#allocation8 + $0x1e4] ss:$8 sps:$4 sm:$0xff]   ;;  %v4112_v14 = vld [vmem:[#allocation8 + $0x1f4] ss:$8 sps:$4 sm:$0xff]  }
 0x213   :  { %1310 = vmatmul.mubr.bf16.vlgmr.msra.gmra.mrb[0].mxu1 %v683_v37  ;;  %2694 = vmatprep.subr.bf16.mxu0 %v4207_v32  ;;  %v4104_v32 = vld [vmem:[#allocation8 + $0x1e0] ss:$8 sps:$4 sm:$0xff]   ;;  %v4110_v37 = vld [vmem:[#allocation8 + $0x1f0] ss:$8 sps:$4 sm:$0xff]  }
 0x214   :  { %1319 = vmatpush1.bf16.msra.mxu1 %v4018_v35 }
 0x215   :  { %1320 = vmatprep.subr.bf16.mxu1 %v4026_v1 }
 0x216   :  { %2695 = vmatpush1.bf16.msra.mxu0 %v4205_v39 }
 0x217   :  { %2696 = vmatprep.subr.bf16.mxu0 %v4213_v40  ;;  %v4118_v40 = vld [vmem:[#allocation8 + $0x204] ss:$8 sps:$4 sm:$0xff]  }
 0x218   :  { %1321 = vmatpush1.bf16.msra.mxu1 %v4024_v41 }
 0x219   :  { %1322 = vmatprep.subr.bf16.mxu1 %v4032_v42  ;;  %v4116_v42 = vld [vmem:[#allocation8 + $0x200] ss:$8 sps:$4 sm:$0xff]  }
 0x21a   :  { %2697 = vmatpush1.bf16.msra.mxu0 %v4211_v43 }
 0x21b   :  { %2698 = vmatprep.subr.bf16.mxu0 %v4219_v44  ;;  %v4124_v44 = vld [vmem:[#allocation8 + $0x214] ss:$8 sps:$4 sm:$0xff]  }
 0x21c   :  { %1323 = vmatpush1.bf16.msra.mxu1 %v4030_v45 }
 0x21d   :  { %1324 = vmatprep.subr.bf16.mxu1 %v4038_v38  ;;  %v4122_v38 = vld [vmem:[#allocation8 + $0x210] ss:$8 sps:$4 sm:$0xff]  }
 0x21e   :  { %2699 = vmatpush1.bf16.msra.mxu0 %v4217_v46  ;;  %v4130_v46 = vld [vmem:[#allocation8 + $0x224] ss:$8 sps:$4 sm:$0xff]  }
 0x21f   :  { %2700 = vmatprep.subr.bf16.mxu0 %v4225_v47  ;;  %v4128_v47 = vld [vmem:[#allocation8 + $0x220] ss:$8 sps:$4 sm:$0xff]  }
 0x220   :  { %1325 = vmatpush1.bf16.msra.mxu1 %v4036_v0  ;;  %v4136_v0 = vld [vmem:[#allocation8 + $0x234] ss:$8 sps:$4 sm:$0xff]  }
 0x221   :  { %1326 = vmatprep.subr.bf16.mxu1 %v4044_v48  ;;  %v4134_v48 = vld [vmem:[#allocation8 + $0x230] ss:$8 sps:$4 sm:$0xff]  }
 0x222   :  { %2701 = vmatpush1.bf16.msra.mxu0 %v4223_v49  ;;  %v4142_v49 = vld [vmem:[#allocation8 + $0x244] ss:$8 sps:$4 sm:$0xff]  }
 0x223   :  { %2702 = vmatprep.subr.bf16.mxu0 %v4231_v50  ;;  %v4140_v50 = vld [vmem:[#allocation8 + $0x240] ss:$8 sps:$4 sm:$0xff]  }
 0x224   :  { %1327 = vmatpush1.bf16.msra.mxu1 %v4042_v51  ;;  %v4148_v51 = vld [vmem:[#allocation8 + $0x254] ss:$8 sps:$4 sm:$0xff]  }
 0x225   :  { %1328 = vmatprep.subr.bf16.mxu1 %v4050_v52  ;;  %v4146_v52 = vld [vmem:[#allocation8 + $0x250] ss:$8 sps:$4 sm:$0xff]  }
 0x226   :  { %2703 = vmatpush1.bf16.msra.mxu0 %v4229_v53  ;;  %v4154_v53 = vld [vmem:[#allocation8 + $0x264] ss:$8 sps:$4 sm:$0xff]  }
 0x227   :  { %2704 = vmatprep.subr.bf16.mxu0 %v4237_v54  ;;  %v4152_v54 = vld [vmem:[#allocation8 + $0x260] ss:$8 sps:$4 sm:$0xff]  }
 0x228   :  { %1329 = vmatpush1.bf16.msra.mxu1 %v4048_v55  ;;  %v4160_v55 = vld [vmem:[#allocation8 + $0x274] ss:$8 sps:$4 sm:$0xff]  }
 0x229   :  { %1330 = vmatprep.subr.bf16.mxu1 %v4056_v56  ;;  %v4158_v56 = vld [vmem:[#allocation8 + $0x270] ss:$8 sps:$4 sm:$0xff]  }
 0x22a   :  { %2705 = vmatpush1.bf16.msra.mxu0 %v4235_v57  ;;  %v4168_v57 = vld [vmem:[#allocation8 + $0x284] ss:$8 sps:$4 sm:$0xff]  }
 0x22b   :  { %2706 = vmatprep.subr.bf16.mxu0 %v4243_v58  ;;  %v4166_v58 = vld [vmem:[#allocation8 + $0x280] ss:$8 sps:$4 sm:$0xff]  }
 0x22c   :  { %v595_v63 = vpop.f32.mrb[2].mxu0  ;;  %1331 = vmatpush1.bf16.msra.mxu1 %v4054_v59  ;;  %v4174_v59 = vld [vmem:[#allocation8 + $0x294] ss:$8 sps:$4 sm:$0xff]  }
 0x22d   :  { %v597_v9 = vpop.f32.mrb[3].mxu0  ;;  %1332 = vmatprep.subr.bf16.mxu1 %v4062_v60  ;;  %v679_v1 = vmul.f32 %v4916_v24, %v595_v63  ;;  %v4172_v60 = vld [vmem:[#allocation8 + $0x290] ss:$8 sps:$4 sm:$0xff]   ;;  %v4186_v63 = vld [vmem:[#allocation8 + $0x2b4] ss:$8 sps:$4 sm:$0xff]  }
 0x22e   :  { %v680_v33 = vmul.f32 %v4916_v24, %v597_v9  ;;  %2707 = vmatpush1.bf16.msra.mxu0 %v4241_v61  ;;  %v4180_v61 = vld [vmem:[#allocation8 + $0x2a4] ss:$8 sps:$4 sm:$0xff]  }
 0x22f   :  { %2708 = vmatprep.subr.bf16.mxu0 %v4249_v62  ;;  %v685_v43 = vpack.c.bf16 %v679_v1, %v679_v1  ;;  %v4178_v62 = vld [vmem:[#allocation8 + $0x2a0] ss:$8 sps:$4 sm:$0xff]   ;;  %v4192_v9 = vld [vmem:[#allocation8 + $0x2c4] ss:$8 sps:$4 sm:$0xff]  }
 0x230   :  { %v686_v16 = vpack.c.bf16 %v680_v33, %v680_v33  ;;  %1333 = vmatpush1.bf16.msra.mxu1 %v4060_v8  ;;  %v4184_v8 = vld [vmem:[#allocation8 + $0x2b0] ss:$8 sps:$4 sm:$0xff]   ;;  %v4198_v33 = vld [vmem:[#allocation8 + $0x2d4] ss:$8 sps:$4 sm:$0xff]  }
 0x231   :  { %1334 = vmatprep.subr.bf16.mxu1 %v4070_v10  ;;  %v4190_v10 = vld [vmem:[#allocation8 + $0x2c0] ss:$8 sps:$4 sm:$0xff]   ;;  %v4263_v1 = vld [vmem:[#allocation11 + $0x10c] ss:$16 sps:$4 sm:$0xff]  }
 0x232   :  { %1350 = vmatprep.mubr.bf16.mxu1 %v686_v16  ;;  %2709 = vmatpush1.bf16.msra.mxu0 %v4247_v12  ;;  %v4196_v12 = vld [vmem:[#allocation8 + $0x2d0] ss:$8 sps:$4 sm:$0xff]   ;;  %v4210_v16 = vld [vmem:[#allocation8 + $0x2f4] ss:$8 sps:$4 sm:$0xff]  }
 0x233   :  { %2710 = vmatprep.subr.bf16.mxu0 %v4255_v13  ;;  %v4204_v13 = vld [vmem:[#allocation8 + $0x2e4] ss:$8 sps:$4 sm:$0xff]  }
 0x234   :  { %1335 = vmatpush1.bf16.msra.mxu1 %v4068_v17  ;;  %v4208_v17 = vld [vmem:[#allocation8 + $0x2f0] ss:$8 sps:$4 sm:$0xff]  }
 0x235   :  { %1336 = vmatprep.subr.bf16.mxu1 %v4076_v18 }
 0x236   :  { %2711 = vmatpush1.bf16.msra.mxu0 %v4253_v19  ;;  %v4216_v19 = vld [vmem:[#allocation11 + $0xc] ss:$16 sps:$4 sm:$0xff]  }
 0x238   :  { %1337 = vmatpush1.bf16.msra.mxu1 %v4074_v20  ;;  %v4214_v20 = vld [vmem:[#allocation11 + $0x8] ss:$16 sps:$4 sm:$0xff]  }
 0x239   :  { %1338 = vmatprep.subr.bf16.mxu1 %v4082_v21  ;;  %2713 = vmatmul.mubr.bf16.vlgmr.msra.gmra.mrb[8].mxu0 %v4924_v22 }
 0x23c   :  { %1339 = vmatpush1.bf16.msra.mxu1 %v4080_v23  ;;  %v4222_v23 = vld [vmem:[#allocation11 + $0x2c] ss:$16 sps:$4 sm:$0xff]  }
 0x23d   :  { %1340 = vmatprep.subr.bf16.mxu1 %v4088_v25  ;;  %v4220_v25 = vld [vmem:[#allocation11 + $0x28] ss:$16 sps:$4 sm:$0xff]  }
 0x240   :  { %1341 = vmatpush1.bf16.msra.mxu1 %v4086_v26  ;;  %v4228_v26 = vld [vmem:[#allocation11 + $0x4c] ss:$16 sps:$4 sm:$0xff]  }
 0x241   :  { %1342 = vmatprep.subr.bf16.mxu1 %v4094_v27  ;;  %v4226_v27 = vld [vmem:[#allocation11 + $0x48] ss:$16 sps:$4 sm:$0xff]  }
 0x244   :  { %1343 = vmatpush1.bf16.msra.mxu1 %v4092_v28  ;;  %v4234_v28 = vld [vmem:[#allocation11 + $0x6c] ss:$16 sps:$4 sm:$0xff]  }
 0x245   :  { %1344 = vmatprep.subr.bf16.mxu1 %v4100_v29  ;;  %v4240_v29 = vld [vmem:[#allocation11 + $0x8c] ss:$16 sps:$4 sm:$0xff]  }
 0x248   :  { %1345 = vmatpush1.bf16.msra.mxu1 %v4098_v30  ;;  %v4238_v30 = vld [vmem:[#allocation11 + $0x88] ss:$16 sps:$4 sm:$0xff]  }
 0x249   :  { %1346 = vmatprep.subr.bf16.mxu1 %v4106_v31  ;;  %v4246_v31 = vld [vmem:[#allocation11 + $0xac] ss:$16 sps:$4 sm:$0xff]  }
 0x24c   :  { %v4927_v35 = vpop.f32.mrb[4].mxu0  ;;  %1347 = vmatpush1.bf16.msra.mxu1 %v4104_v32  ;;  %v4244_v32 = vld [vmem:[#allocation11 + $0xa8] ss:$16 sps:$4 sm:$0xff]  }
 0x24d   :  { %v668_v39 = vpop.f32.mrb[5].mxu0  ;;  %1348 = vmatprep.subr.bf16.mxu1 %v4112_v14  ;;  %v681_v18 = vmul.f32 %v4916_v24, %v4927_v35  ;;  %v4252_v14 = vld [vmem:[#allocation11 + $0xcc] ss:$16 sps:$4 sm:$0xff]  }
 0x24e   :  { %v682_v41 = vmul.f32 %v4916_v24, %v668_v39  ;;  %v4232_v24 = vld [vmem:[#allocation11 + $0x68] ss:$16 sps:$4 sm:$0xff]   ;;  %v4258_v35 = vld [vmem:[#allocation11 + $0xec] ss:$16 sps:$4 sm:$0xff]  }
 0x24f   :  { %v687_v21 = vpack.c.bf16 %v681_v18, %v681_v18  ;;  %v4261_v39 = vld [vmem:[#allocation11 + $0x108] ss:$16 sps:$4 sm:$0xff]   ;;  %v4302_v18 = vld [vmem:[#allocation11 + $0x2ac] ss:$16 sps:$4 sm:$0xff]  }
 0x250   :  { %1349 = vmatpush1.bf16.msra.mxu1 %v4110_v37  ;;  %v688_v45 = vpack.c.bf16 %v682_v41, %v682_v41  ;;  %v4256_v37 = vld [vmem:[#allocation11 + $0xe8] ss:$16 sps:$4 sm:$0xff]  }
 0x251   :  { %1359 = vmatprep.subr.bf16.mxu1 %v4118_v40  ;;  %v4266_v40 = vld [vmem:[#allocation11 + $0x12c] ss:$16 sps:$4 sm:$0xff]   ;;  %v4264_v41 = vld [vmem:[#allocation11 + $0x128] ss:$16 sps:$4 sm:$0xff]  }
 0x253   :  { %1351 = vmatmul.mubr.bf16.vlgmr.msra.gmra.mrb[0].mxu1 %v685_v43  ;;  %v4267_v43 = vld [vmem:[#allocation11 + $0x148] ss:$16 sps:$4 sm:$0xff]  }
 0x254   :  { %1360 = vmatpush1.bf16.msra.mxu1 %v4116_v42  ;;  %1391 = vmatprep.mubr.bf16.mxu1 %v688_v45  ;;  %v4269_v42 = vld [vmem:[#allocation11 + $0x14c] ss:$16 sps:$4 sm:$0xff]   ;;  %v4270_v45 = vld [vmem:[#allocation11 + $0x168] ss:$16 sps:$4 sm:$0xff]  }
 0x255   :  { %1361 = vmatprep.subr.bf16.mxu1 %v4124_v44  ;;  %v4272_v44 = vld [vmem:[#allocation11 + $0x16c] ss:$16 sps:$4 sm:$0xff]  }
 0x258   :  { %1362 = vmatpush1.bf16.msra.mxu1 %v4122_v38  ;;  %v4275_v38 = vld [vmem:[#allocation11 + $0x18c] ss:$16 sps:$4 sm:$0xff]  }
 0x259   :  { %1363 = vmatprep.subr.bf16.mxu1 %v4130_v46  ;;  %v4273_v46 = vld [vmem:[#allocation11 + $0x188] ss:$16 sps:$4 sm:$0xff]  }
 0x25c   :  { %1364 = vmatpush1.bf16.msra.mxu1 %v4128_v47  ;;  %v4278_v47 = vld [vmem:[#allocation11 + $0x1ac] ss:$16 sps:$4 sm:$0xff]  }
 0x25d   :  { %1365 = vmatprep.subr.bf16.mxu1 %v4136_v0  ;;  %v4276_v0 = vld [vmem:[#allocation11 + $0x1a8] ss:$16 sps:$4 sm:$0xff]  }
 0x260   :  { %1366 = vmatpush1.bf16.msra.mxu1 %v4134_v48  ;;  %v4281_v48 = vld [vmem:[#allocation11 + $0x1cc] ss:$16 sps:$4 sm:$0xff]  }
 0x261   :  { %1367 = vmatprep.subr.bf16.mxu1 %v4142_v49  ;;  %v4279_v49 = vld [vmem:[#allocation11 + $0x1c8] ss:$16 sps:$4 sm:$0xff]  }
 0x264   :  { %1368 = vmatpush1.bf16.msra.mxu1 %v4140_v50  ;;  %v4284_v50 = vld [vmem:[#allocation11 + $0x1ec] ss:$16 sps:$4 sm:$0xff]  }
 0x265   :  { %1369 = vmatprep.subr.bf16.mxu1 %v4148_v51  ;;  %v4378_v51 = vld [vmem:[#allocation14 + $0x40] sm:$0xff]  }
 0x266   :  { %3733 = vmatprep.subr.bf16.mxu0 %v4378_v51  ;;  %v4336_v51 = vld [vmem:[#allocation11 + $0x428] ss:$16 sps:$4 sm:$0xff]  }
 0x268   :  { %1370 = vmatpush1.bf16.msra.mxu1 %v4146_v52  ;;  %v4282_v52 = vld [vmem:[#allocation11 + $0x1e8] ss:$16 sps:$4 sm:$0xff]  }
 0x269   :  { %1371 = vmatprep.subr.bf16.mxu1 %v4154_v53  ;;  %v4379_v53 = vld [vmem:[#allocation14] sm:$0xff]  }
 0x26a   :  { %3734 = vmatpush3.bf16.msra.mxu0 %v4379_v53  ;;  %v4339_v53 = vld [vmem:[#allocation11 + $0x448] ss:$16 sps:$4 sm:$0xff]  }
 0x26c   :  { %1372 = vmatpush1.bf16.msra.mxu1 %v4152_v54  ;;  %v4287_v54 = vld [vmem:[#allocation11 + $0x20c] ss:$16 sps:$4 sm:$0xff]  }
 0x26d   :  { %1373 = vmatprep.subr.bf16.mxu1 %v4160_v55  ;;  %v4383_v55 = vld [vmem:[#allocation14 + $0x48] sm:$0xff]  }
 0x26e   :  { %3735 = vmatprep.subr.bf16.mxu0 %v4383_v55  ;;  %v4342_v55 = vld [vmem:[#allocation11 + $0x468] ss:$16 sps:$4 sm:$0xff]  }
 0x270   :  { %1374 = vmatpush1.bf16.msra.mxu1 %v4158_v56  ;;  %v4285_v56 = vld [vmem:[#allocation11 + $0x208] ss:$16 sps:$4 sm:$0xff]  }
 0x271   :  { %1375 = vmatprep.subr.bf16.mxu1 %v4168_v57  ;;  %v4384_v57 = vld [vmem:[#allocation14 + $0x8] sm:$0xff]  }
 0x272   :  { %3736 = vmatpush3.bf16.msra.mxu0 %v4384_v57  ;;  %v4345_v57 = vld [vmem:[#allocation11 + $0x488] ss:$16 sps:$4 sm:$0xff]  }
 0x274   :  { %1376 = vmatpush1.bf16.msra.mxu1 %v4166_v58  ;;  %v4290_v58 = vld [vmem:[#allocation11 + $0x22c] ss:$16 sps:$4 sm:$0xff]  }
 0x275   :  { %1377 = vmatprep.subr.bf16.mxu1 %v4174_v59  ;;  %v4385_v59 = vld [vmem:[#allocation14 + $0x50] sm:$0xff]  }
 0x276   :  { %3737 = vmatprep.subr.bf16.mxu0 %v4385_v59  ;;  %v4353_v59 = vld [vmem:[#allocation11 + $0x4cc] ss:$16 sps:$4 sm:$0xff]  }
 0x278   :  { %1378 = vmatpush1.bf16.msra.mxu1 %v4172_v60  ;;  %v4386_v60 = vld [vmem:[#allocation14 + $0x10] sm:$0xff]  }
 0x279   :  { %1379 = vmatprep.subr.bf16.mxu1 %v4180_v61  ;;  %v4387_v61 = vld [vmem:[#allocation14 + $0x58] sm:$0xff]   ;;  %3738 = vmatpush3.bf16.msra.mxu0 %v4386_v60 }
 0x27a   :  { %3739 = vmatprep.subr.bf16.mxu0 %v4387_v61  ;;  %v4356_v60 = vld [vmem:[#allocation11 + $0x4ec] ss:$16 sps:$4 sm:$0xff]   ;;  %v4354_v61 = vld [vmem:[#allocation11 + $0x4e8] ss:$16 sps:$4 sm:$0xff]  }
 0x27c   :  { %1380 = vmatpush1.bf16.msra.mxu1 %v4178_v62  ;;  %v4288_v62 = vld [vmem:[#allocation11 + $0x228] ss:$16 sps:$4 sm:$0xff]  }
 0x27d   :  { %1381 = vmatprep.subr.bf16.mxu1 %v4186_v63  ;;  %v4293_v63 = vld [vmem:[#allocation11 + $0x24c] ss:$16 sps:$4 sm:$0xff]  }
 0x280   :  { %1382 = vmatpush1.bf16.msra.mxu1 %v4184_v8  ;;  %v4388_v8 = vld [vmem:[#allocation14 + $0x18] sm:$0xff]  }
 0x281   :  { %1383 = vmatprep.subr.bf16.mxu1 %v4192_v9  ;;  %v4389_v9 = vld [vmem:[#allocation14 + $0x60] sm:$0xff]   ;;  %3740 = vmatpush3.bf16.msra.mxu0 %v4388_v8  ;;  %v4362_v8 = vld [vmem:[#allocation11 + $0x52c] ss:$16 sps:$4 sm:$0xff]  }
 0x282   :  { %3741 = vmatprep.subr.bf16.mxu0 %v4389_v9  ;;  %v4360_v9 = vld [vmem:[#allocation11 + $0x528] ss:$16 sps:$4 sm:$0xff]  }
 0x284   :  { %1384 = vmatpush1.bf16.msra.mxu1 %v4190_v10  ;;  %v4291_v10 = vld [vmem:[#allocation11 + $0x248] ss:$16 sps:$4 sm:$0xff]  }
 0x285   :  { %1385 = vmatprep.subr.bf16.mxu1 %v4198_v33  ;;  %v4296_v33 = vld [vmem:[#allocation11 + $0x26c] ss:$16 sps:$4 sm:$0xff]  }
 0x288   :  { %1386 = vmatpush1.bf16.msra.mxu1 %v4196_v12  ;;  %v4391_v12 = vld [vmem:[#allocation14 + $0x68] sm:$0xff]  }
 0x289   :  { %1387 = vmatprep.subr.bf16.mxu1 %v4204_v13  ;;  %v4294_v13 = vld [vmem:[#allocation11 + $0x268] ss:$16 sps:$4 sm:$0xff]  }
 0x28c   :  { %1388 = vmatpush1.bf16.msra.mxu1 %v4202_v15  ;;  %v4299_v15 = vld [vmem:[#allocation11 + $0x28c] ss:$16 sps:$4 sm:$0xff]  }
 0x28d   :  { %1389 = vmatprep.subr.bf16.mxu1 %v4210_v16  ;;  %v4393_v16 = vld [vmem:[#allocation14 + $0x70] sm:$0xff]  }
 0x290   :  { %1390 = vmatpush1.bf16.msra.mxu1 %v4208_v17  ;;  %v4297_v17 = vld [vmem:[#allocation11 + $0x288] ss:$16 sps:$4 sm:$0xff]  }
 0x291   :  { %2721 = vmatprep.subr.bf16.mxu1 %v4216_v19  ;;  %v4394_v19 = vld [vmem:[#allocation14 + $0x30] sm:$0xff]  }
 0x293   :  { %1392 = vmatmul.mubr.bf16.vlgmr.msra.gmra.mrb[0].mxu1 %v687_v21  ;;  %v4305_v21 = vld [vmem:[#allocation11 + $0x2cc] ss:$16 sps:$4 sm:$0xff]  }
 0x294   :  { %2722 = vmatpush1.bf16.msra.mxu1 %v4214_v20  ;;  %2753 = vmatprep.mubr.bf16.mxu1 %v4904_v34  ;;  %v4250_v34 = vld [vmem:[#allocation11 + $0xc8] ss:$16 sps:$4 sm:$0xff]  }
 0x295   :  { %2723 = vmatprep.subr.bf16.mxu1 %v4222_v23  ;;  %v4300_v20 = vld [vmem:[#allocation11 + $0x2a8] ss:$16 sps:$4 sm:$0xff]  }
 0x296   :  { %v4395_v23 = vld [vmem:[#allocation14 + $0x78] sm:$0xff]  }
 0x298   :  { %2724 = vmatpush1.bf16.msra.mxu1 %v4220_v25  ;;  %v4303_v25 = vld [vmem:[#allocation11 + $0x2c8] ss:$16 sps:$4 sm:$0xff]  }
 0x299   :  { %2725 = vmatprep.subr.bf16.mxu1 %v4228_v26  ;;  %v4396_v26 = vld [vmem:[#allocation14 + $0x38] sm:$0xff]  }
 0x29c   :  { %2726 = vmatpush1.bf16.msra.mxu1 %v4226_v27  ;;  %v4308_v27 = vld [vmem:[#allocation11 + $0x2ec] ss:$16 sps:$4 sm:$0xff]  }
 0x29d   :  { %2727 = vmatprep.subr.bf16.mxu1 %v4234_v28  ;;  %v4397_v28 = vld [vmem:[#allocation13 + $0x40] sm:$0xff]  }
 0x2a0   :  { %2728 = vmatpush1.bf16.msra.mxu1 %v4232_v24  ;;  %v4306_v24 = vld [vmem:[#allocation11 + $0x2e8] ss:$16 sps:$4 sm:$0xff]  }
 0x2a1   :  { %2729 = vmatprep.subr.bf16.mxu1 %v4240_v29  ;;  %v4311_v29 = vld [vmem:[#allocation11 + $0x30c] ss:$16 sps:$4 sm:$0xff]  }
 0x2a4   :  { %2730 = vmatpush1.bf16.msra.mxu1 %v4238_v30  ;;  %v4309_v30 = vld [vmem:[#allocation11 + $0x308] ss:$16 sps:$4 sm:$0xff]  }
 0x2a5   :  { %2731 = vmatprep.subr.bf16.mxu1 %v4246_v31  ;;  %v4314_v31 = vld [vmem:[#allocation11 + $0x32c] ss:$16 sps:$4 sm:$0xff]  }
 0x2a8   :  { %2732 = vmatpush1.bf16.msra.mxu1 %v4244_v32  ;;  %v4312_v32 = vld [vmem:[#allocation11 + $0x328] ss:$16 sps:$4 sm:$0xff]  }
 0x2a9   :  { %2733 = vmatprep.subr.bf16.mxu1 %v4252_v14  ;;  %v4317_v14 = vld [vmem:[#allocation11 + $0x34c] ss:$16 sps:$4 sm:$0xff]  }
 0x2ac   :  { %2734 = vmatpush1.bf16.msra.mxu1 %v4250_v34  ;;  %v4315_v34 = vld [vmem:[#allocation11 + $0x348] ss:$16 sps:$4 sm:$0xff]  }
 0x2ad   :  { %2735 = vmatprep.subr.bf16.mxu1 %v4258_v35  ;;  %v4320_v35 = vld [vmem:[#allocation11 + $0x36c] ss:$16 sps:$4 sm:$0xff]  }
 0x2b0   :  { %2736 = vmatpush1.bf16.msra.mxu1 %v4256_v37  ;;  %v4318_v37 = vld [vmem:[#allocation11 + $0x368] ss:$16 sps:$4 sm:$0xff]  }
 0x2b1   :  { %2737 = vmatprep.subr.bf16.mxu1 %v4263_v1  ;;  %v4323_v1 = vld [vmem:[#allocation11 + $0x38c] ss:$16 sps:$4 sm:$0xff]  }
 0x2b4   :  { %2738 = vmatpush1.bf16.msra.mxu1 %v4261_v39  ;;  %v4321_v39 = vld [vmem:[#allocation11 + $0x388] ss:$16 sps:$4 sm:$0xff]  }
 0x2b5   :  { %2739 = vmatprep.subr.bf16.mxu1 %v4266_v40  ;;  %v4326_v40 = vld [vmem:[#allocation11 + $0x3ac] ss:$16 sps:$4 sm:$0xff]  }
 0x2b8   :  { %2740 = vmatpush1.bf16.msra.mxu1 %v4264_v41  ;;  %v4324_v41 = vld [vmem:[#allocation11 + $0x3a8] ss:$16 sps:$4 sm:$0xff]  }
 0x2b9   :  { %2741 = vmatprep.subr.bf16.mxu1 %v4269_v42  ;;  %v4329_v42 = vld [vmem:[#allocation11 + $0x3cc] ss:$16 sps:$4 sm:$0xff]  }
 0x2bc   :  { %2742 = vmatpush1.bf16.msra.mxu1 %v4267_v43  ;;  %v4327_v43 = vld [vmem:[#allocation11 + $0x3c8] ss:$16 sps:$4 sm:$0xff]  }
 0x2bd   :  { %2743 = vmatprep.subr.bf16.mxu1 %v4272_v44  ;;  %v4332_v44 = vld [vmem:[#allocation11 + $0x3ec] ss:$16 sps:$4 sm:$0xff]  }
 0x2c0   :  { %2744 = vmatpush1.bf16.msra.mxu1 %v4270_v45  ;;  %v4330_v45 = vld [vmem:[#allocation11 + $0x3e8] ss:$16 sps:$4 sm:$0xff]  }
 0x2c1   :  { %2745 = vmatprep.subr.bf16.mxu1 %v4275_v38 }
 0x2c4   :  { %2746 = vmatpush1.bf16.msra.mxu1 %v4273_v46  ;;  %v4335_v46 = vld [vmem:[#allocation11 + $0x40c] ss:$16 sps:$4 sm:$0xff]  }
 0x2c5   :  { %2747 = vmatprep.subr.bf16.mxu1 %v4278_v47 }
 0x2c8   :  { %2748 = vmatpush1.bf16.msra.mxu1 %v4276_v0 }
 0x2c9   :  { %2749 = vmatprep.subr.bf16.mxu1 %v4281_v48 }
 0x2cc   :  { %2750 = vmatpush1.bf16.msra.mxu1 %v4279_v49  ;;  %v4333_v49 = vld [vmem:[#allocation11 + $0x408] ss:$16 sps:$4 sm:$0xff]  }
 0x2cd   :  { %2751 = vmatprep.subr.bf16.mxu1 %v4284_v50  ;;  %v4338_v50 = vld [vmem:[#allocation11 + $0x42c] ss:$16 sps:$4 sm:$0xff]  }
 0x2d0   :  { %2752 = vmatpush1.bf16.msra.mxu1 %v4282_v52  ;;  %v4341_v52 = vld [vmem:[#allocation11 + $0x44c] ss:$16 sps:$4 sm:$0xff]  }
 0x2d1   :  { %2762 = vmatprep.subr.bf16.mxu1 %v4287_v54  ;;  %v4344_v54 = vld [vmem:[#allocation11 + $0x46c] ss:$16 sps:$4 sm:$0xff]  }
 0x2d3   :  { %2754 = vmatmul.mubr.bf16.vlgmr.msra.gmra.mrb[4].mxu1 %v4907_v36  ;;  %v4390_v36 = vld [vmem:[#allocation14 + $0x20] sm:$0xff]  }
 0x2d4   :  { %2763 = vmatpush1.bf16.msra.mxu1 %v4285_v56  ;;  %2794 = vmatprep.mubr.bf16.mxu1 %v4910_v2  ;;  %v4392_v2 = vld [vmem:[#allocation14 + $0x28] sm:$0xff]  }
 0x2d5   :  { %2764 = vmatprep.subr.bf16.mxu1 %v4290_v58  ;;  %3742 = vmatpush3.bf16.msra.mxu0 %v4390_v36  ;;  %v4347_v56 = vld [vmem:[#allocation11 + $0x48c] ss:$16 sps:$4 sm:$0xff]  }
 0x2d6   :  { %3743 = vmatprep.subr.bf16.mxu0 %v4391_v12  ;;  %v4350_v58 = vld [vmem:[#allocation11 + $0x4ac] ss:$16 sps:$4 sm:$0xff]   ;;  %v4366_v12 = vld [vmem:[#allocation11 + $0x568] ss:$16 sps:$4 sm:$0xff]  }
 0x2d7   :  { %v4368_v36 = vld [vmem:[#allocation11 + $0x56c] ss:$16 sps:$4 sm:$0xff]  }
 0x2d8   :  { %2765 = vmatpush1.bf16.msra.mxu1 %v4288_v62  ;;  %v4359_v62 = vld [vmem:[#allocation11 + $0x50c] ss:$16 sps:$4 sm:$0xff]  }
 0x2d9   :  { %2766 = vmatprep.subr.bf16.mxu1 %v4293_v63  ;;  %3744 = vmatpush3.bf16.msra.mxu0 %v4392_v2  ;;  %v4357_v63 = vld [vmem:[#allocation11 + $0x508] ss:$16 sps:$4 sm:$0xff]   ;;  %v4374_v2 = vld [vmem:[#allocation11 + $0x5ac] ss:$16 sps:$4 sm:$0xff]  }
 0x2da   :  { %3745 = vmatprep.subr.bf16.mxu0 %v4393_v16  ;;  %v4372_v16 = vld [vmem:[#allocation11 + $0x5a8] ss:$16 sps:$4 sm:$0xff]  }
 0x2dc   :  { %2767 = vmatpush1.bf16.msra.mxu1 %v4291_v10  ;;  %v4365_v10 = vld [vmem:[#allocation11 + $0x54c] ss:$16 sps:$4 sm:$0xff]  }
 0x2dd   :  { %2768 = vmatprep.subr.bf16.mxu1 %v4296_v33  ;;  %3746 = vmatpush3.bf16.msra.mxu0 %v4394_v19  ;;  %v4363_v33 = vld [vmem:[#allocation11 + $0x548] ss:$16 sps:$4 sm:$0xff]   ;;  %v4382_v19 = vld [vmem:[#allocation11 + $0x5ec] ss:$16 sps:$4 sm:$0xff]  }
 0x2de   :  { %3747 = vmatprep.subr.bf16.mxu0 %v4395_v23  ;;  %v785_v23 = vld [vmem:[%s4982_s4] sm:$0x3] }
 0x2e0   :  { %2769 = vmatpush1.bf16.msra.mxu1 %v4294_v13  ;;  %v4371_v13 = vld [vmem:[#allocation11 + $0x58c] ss:$16 sps:$4 sm:$0xff]  }
 0x2e1   :  { %2770 = vmatprep.subr.bf16.mxu1 %v4299_v15  ;;  %3748 = vmatpush3.bf16.msra.mxu0 %v4396_v26  ;;  %v4369_v15 = vld [vmem:[#allocation11 + $0x588] ss:$16 sps:$4 sm:$0xff]   ;;  %v790_v26 = vrot.slane %v785_v23, %v4830_v4 }
 0x2e2   :  { %3755 = vmatprep.subr.bf16.mxu0 %v4397_v28 }
 0x2e4   :  { %2771 = vmatpush1.bf16.msra.mxu1 %v4297_v17  ;;  %v4377_v17 = vld [vmem:[#allocation11 + $0x5cc] ss:$16 sps:$4 sm:$0xff]  }
 0x2e5   :  { %2772 = vmatprep.subr.bf16.mxu1 %v4302_v18  ;;  %v4375_v18 = vld [vmem:[#allocation11 + $0x5c8] ss:$16 sps:$4 sm:$0xff]  }
 0x2e8   :  { %2773 = vmatpush1.bf16.msra.mxu1 %v4300_v20  ;;  %v4380_v20 = vld [vmem:[#allocation11 + $0x5e8] ss:$16 sps:$4 sm:$0xff]  }
 0x2e9   :  { %2774 = vmatprep.subr.bf16.mxu1 %v4305_v21  ;;  %v4946_v21 = vld [vmem:[%s4985_s7] sm:$0xf] }
 0x2ec   :  { %2775 = vmatpush1.bf16.msra.mxu1 %v4303_v25  ;;  %v1604_v25 = vrot.slane %v4946_v21, %v4836_v6 }
 0x2ed   :  { %2776 = vmatprep.subr.bf16.mxu1 %v4308_v27  ;;  %v794_v27 = vrot.slane %v785_v23, %v4836_v6  ;;  %v4401_v6 = vld [vmem:[#allocation13 + $0x50] sm:$0xff]  }
 0x2f0   :  { %2777 = vmatpush1.bf16.msra.mxu1 %v4306_v24 }
 0x2f1   :  { %2778 = vmatprep.subr.bf16.mxu1 %v4311_v29 }
 0x2f4   :  { %2779 = vmatpush1.bf16.msra.mxu1 %v4309_v30 }
 0x2f5   :  { %2780 = vmatprep.subr.bf16.mxu1 %v4314_v31 }
 0x2f8   :  { %2781 = vmatpush1.bf16.msra.mxu1 %v4312_v32 }
 0x2f9   :  { %2782 = vmatprep.subr.bf16.mxu1 %v4317_v14 }
 0x2fc   :  { %2783 = vmatpush1.bf16.msra.mxu1 %v4315_v34  ;;  %v4398_v34 = vld [vmem:[#allocation13] sm:$0xff]  }
 0x2fd   :  { %2784 = vmatprep.subr.bf16.mxu1 %v4320_v35 }
 0x300   :  { %2785 = vmatpush1.bf16.msra.mxu1 %v4318_v37 }
 0x301   :  { %2786 = vmatprep.subr.bf16.mxu1 %v4323_v1  ;;  %v4399_v1 = vld [vmem:[#allocation13 + $0x48] sm:$0xff]  }
 0x304   :  { %2787 = vmatpush1.bf16.msra.mxu1 %v4321_v39  ;;  %v4400_v39 = vld [vmem:[#allocation13 + $0x8] sm:$0xff]  }
 0x305   :  { %2788 = vmatprep.subr.bf16.mxu1 %v4326_v40  ;;  %v4402_v40 = vld [vmem:[#allocation13 + $0x10] sm:$0xff]  }
 0x308   :  { %2789 = vmatpush1.bf16.msra.mxu1 %v4324_v41  ;;  %v4403_v41 = vld [vmem:[#allocation13 + $0x58] sm:$0xff]  }
 0x309   :  { %2790 = vmatprep.subr.bf16.mxu1 %v4329_v42  ;;  %v4404_v42 = vld [vmem:[#allocation13 + $0x18] sm:$0xff]  }
 0x30c   :  { %2791 = vmatpush1.bf16.msra.mxu1 %v4327_v43  ;;  %v4936_v38 = vpop.f32.mrb[8].mxu0  ;;  %v4405_v43 = vld [vmem:[#allocation13 + $0x60] sm:$0xff]  }
 0x30d   :  { %2792 = vmatprep.subr.bf16.mxu1 %v4332_v44  ;;  %v4938_v47 = vpop.f32.mrb[9].mxu0  ;;  %v4406_v44 = vld [vmem:[#allocation13 + $0x20] sm:$0xff]  }
 0x30e   :  { %v2718_v0 = vpop.f32.mrb[10].mxu0  ;;  %v3898_v24 = vadd.f32 %v4938_v47, %v1604_v25  ;;  %v4409_v47 = vld [vmem:[#allocation13 + $0x70] sm:$0xff]  }
 0x30f   :  { %v2719_v48 = vpop.f32.mrb[11].mxu0  ;;  %v1600_v0 = vrot.slane %v4946_v21, %v4830_v4  ;;  %v4417_v4 = vld [vmem:[#allocation13 + $0xd0] sm:$0xff]  }
 0x310   :  { %2793 = vmatpush1.bf16.msra.mxu1 %v4330_v45  ;;  %v2845_v35 = vpack.c.bf16 %v3898_v24, %v3898_v24  ;;  %v4407_v45 = vld [vmem:[#allocation13 + $0x68] sm:$0xff]   ;;  %v4410_v48 = vld [vmem:[#allocation13 + $0x30] sm:$0xff]  }
 0x311   :  { %2803 = vmatprep.subr.bf16.mxu1 %v4335_v46  ;;  %v4408_v46 = vld [vmem:[#allocation13 + $0x28] sm:$0xff]  }
 0x313   :  { %2795 = vmatmul.mubr.bf16.vlgmr.msra.gmra.mrb[4].mxu1 %v4913_v11  ;;  %v4348_v11 = vld [vmem:[#allocation11 + $0x4a8] ss:$16 sps:$4 sm:$0xff]  }
 0x314   :  { %2804 = vmatpush1.bf16.msra.mxu1 %v4333_v49  ;;  %2835 = vmatprep.mubr.bf16.mxu1 %v4921_v7  ;;  %v4351_v7 = vld [vmem:[#allocation11 + $0x4c8] ss:$16 sps:$4 sm:$0xff]  }
 0x315   :  { %2805 = vmatprep.subr.bf16.mxu1 %v4338_v50  ;;  %v4411_v49 = vld [vmem:[#allocation13 + $0x78] sm:$0xff]   ;;  %v3897_v50 = vadd.f32 %v4936_v38, %v1600_v0 }
 0x316   :  { %v4420_v38 = vld [vmem:[#allocation13 + $0x98] sm:$0xff]  }
 0x318   :  { %2806 = vmatpush1.bf16.msra.mxu1 %v4336_v51  ;;  %v4412_v51 = vld [vmem:[#allocation13 + $0x38] sm:$0xff]  }
 0x319   :  { %2807 = vmatprep.subr.bf16.mxu1 %v4341_v52  ;;  %v4413_v52 = vld [vmem:[#allocation13 + $0xc0] sm:$0xff]  }
 0x31c   :  { %2808 = vmatpush1.bf16.msra.mxu1 %v4339_v53  ;;  %v2844_v53 = vpack.c.bf16 %v3897_v50, %v3897_v50 }
 0x31d   :  { %2809 = vmatprep.subr.bf16.mxu1 %v4344_v54  ;;  %v4414_v54 = vld [vmem:[#allocation13 + $0x80] sm:$0xff]  }
 0x320   :  { %2810 = vmatpush1.bf16.msra.mxu1 %v4342_v55  ;;  %v4415_v55 = vld [vmem:[#allocation13 + $0xc8] sm:$0xff]  }
 0x321   :  { %2811 = vmatprep.subr.bf16.mxu1 %v4347_v56  ;;  %v4416_v56 = vld [vmem:[#allocation13 + $0x88] sm:$0xff]  }
 0x324   :  { %2812 = vmatpush1.bf16.msra.mxu1 %v4345_v57  ;;  %v4418_v57 = vld [vmem:[#allocation13 + $0x90] sm:$0xff]  }
 0x325   :  { %2813 = vmatprep.subr.bf16.mxu1 %v4350_v58  ;;  %v4419_v58 = vld [vmem:[#allocation13 + $0xd8] sm:$0xff]  }
 0x328   :  { %2814 = vmatpush1.bf16.msra.mxu1 %v4348_v11  ;;  %v4421_v11 = vld [vmem:[#allocation13 + $0xe0] sm:$0xff]  }
 0x329   :  { %2815 = vmatprep.subr.bf16.mxu1 %v4353_v59  ;;  %v4422_v59 = vld [vmem:[#allocation13 + $0xa0] sm:$0xff]  }
 0x32c   :  { %2816 = vmatpush1.bf16.msra.mxu1 %v4351_v7  ;;  %v4423_v7 = vld [vmem:[#allocation13 + $0xe8] sm:$0xff]  }
 0x32d   :  { %2817 = vmatprep.subr.bf16.mxu1 %v4356_v60  ;;  %v4424_v60 = vld [vmem:[#allocation13 + $0xa8] sm:$0xff]  }
 0x330   :  { %2818 = vmatpush1.bf16.msra.mxu1 %v4354_v61  ;;  %v4425_v61 = vld [vmem:[#allocation13 + $0xf0] sm:$0xff]  }
 0x331   :  { %2819 = vmatprep.subr.bf16.mxu1 %v4359_v62  ;;  %v4426_v62 = vld [vmem:[#allocation13 + $0xb0] sm:$0xff]  }
 0x334   :  { %2820 = vmatpush1.bf16.msra.mxu1 %v4357_v63  ;;  %v4427_v63 = vld [vmem:[#allocation13 + $0xf8] sm:$0xff]  }
 0x335   :  { %2821 = vmatprep.subr.bf16.mxu1 %v4362_v8  ;;  %v4428_v8 = vld [vmem:[#allocation13 + $0xb8] sm:$0xff]  }
 0x338   :  { %2822 = vmatpush1.bf16.msra.mxu1 %v4360_v9  ;;  %v1608_v9 = vrot.slane %v4946_v21, %v4827_v3 }
 0x339   :  { %2823 = vmatprep.subr.bf16.mxu1 %v4365_v10  ;;  %v1612_v10 = vrot.slane %v4946_v21, %v4833_v5 }
 0x33c   :  { %2824 = vmatpush1.bf16.msra.mxu1 %v4363_v33 }
 0x33d   :  { %2825 = vmatprep.subr.bf16.mxu1 %v4368_v36 }
 0x340   :  { %2826 = vmatpush1.bf16.msra.mxu1 %v4366_v12 }
 0x341   :  { %2827 = vmatprep.subr.bf16.mxu1 %v4371_v13 }
 0x344   :  { %2828 = vmatpush1.bf16.msra.mxu1 %v4369_v15 }
 0x345   :  { %2829 = vmatprep.subr.bf16.mxu1 %v4374_v2 }
 0x348   :  { %2830 = vmatpush1.bf16.msra.mxu1 %v4372_v16 }
 0x349   :  { %2831 = vmatprep.subr.bf16.mxu1 %v4377_v17 }
 0x34c   :  { %2832 = vmatpush1.bf16.msra.mxu1 %v4375_v18 }
 0x34d   :  { %2833 = vmatprep.subr.bf16.mxu1 %v4382_v19 }
 0x350   :  { %2834 = vmatpush1.bf16.msra.mxu1 %v4380_v20 }
 0x353   :  { %2836 = vmatmul.mubr.bf16.vlgmr.msra.gmra.mrb[4].mxu1 %v4924_v22 }
 0x366   :  { %v1393_v28 = vpop.f32.mrb[0].mxu1 }
 0x367   :  { %v3895_v22 = vadd.f32 %v1393_v28, %v790_v26  ;;  %v1395_v29 = vpop.f32.mrb[1].mxu1 }
 0x368   :  { %v3896_v30 = vadd.f32 %v1395_v29, %v794_v27  ;;  %v1397_v31 = vpop.f32.mrb[2].mxu1 }
 0x369   :  { %v1398_v32 = vpop.f32.mrb[3].mxu1  ;;  %v2912_v37 = vpack.c.bf16 %v3895_v22, %v3895_v22 }
 0x36a   :  { %v2913_v14 = vpack.c.bf16 %v3896_v30, %v3896_v30  ;;  %v3732_v32 = vld [vmem:[%s4988_s10] ss:$0 sm:$0xff] }
 0x36c   :  { %3074 = vmatprep.mubr.bf16.mxu0 %v2913_v14 }
 0x36d   :  { %3075 = vmatmul.mubr.bf16.vlgmr.msra.gmra.mrb[12].mxu0 %v2912_v37 }
 0x36e   :  { %3756 = vmatpush3.bf16.msra.mxu0 %v4398_v34  ;;  %3306 = vmatprep.mubr.bf16.mxu0 %v2845_v35 }
 0x36f   :  { %3757 = vmatprep.subr.bf16.mxu0 %v4399_v1 }
 0x372   :  { %3758 = vmatpush3.bf16.msra.mxu0 %v4400_v39 }
 0x373   :  { %3759 = vmatprep.subr.bf16.mxu0 %v4401_v6 }
 0x376   :  { %3760 = vmatpush3.bf16.msra.mxu0 %v4402_v40 }
 0x377   :  { %3761 = vmatprep.subr.bf16.mxu0 %v4403_v41 }
 0x37a   :  { %3762 = vmatpush3.bf16.msra.mxu0 %v4404_v42 }
 0x37b   :  { %3763 = vmatprep.subr.bf16.mxu0 %v4405_v43 }
 0x37e   :  { %3764 = vmatpush3.bf16.msra.mxu0 %v4406_v44 }
 0x37f   :  { %3765 = vmatprep.subr.bf16.mxu0 %v4407_v45 }
 0x382   :  { %3766 = vmatpush3.bf16.msra.mxu0 %v4408_v46 }
 0x383   :  { %3767 = vmatprep.subr.bf16.mxu0 %v4409_v47 }
 0x386   :  { %3768 = vmatpush3.bf16.msra.mxu0 %v4410_v48 }
 0x387   :  { %3769 = vmatprep.subr.bf16.mxu0 %v4411_v49 }
 0x38a   :  { %3770 = vmatpush3.bf16.msra.mxu0 %v4412_v51 }
 0x38b   :  { %3777 = vmatprep.subr.bf16.mxu0 %v4413_v52 }
 0x38d   :  { %3307 = vmatmul.mubr.bf16.vlgmr.msra.gmra.mrb[16].mxu0 %v2844_v53 }
 0x38e   :  { %3778 = vmatpush3.bf16.msra.mxu0 %v4414_v54 }
 0x38f   :  { %3779 = vmatprep.subr.bf16.mxu0 %v4415_v55 }
 0x392   :  { %3780 = vmatpush3.bf16.msra.mxu0 %v4416_v56 }
 0x393   :  { %3781 = vmatprep.subr.bf16.mxu0 %v4417_v4 }
 0x396   :  { %3782 = vmatpush3.bf16.msra.mxu0 %v4418_v57 }
 0x397   :  { %3783 = vmatprep.subr.bf16.mxu0 %v4419_v58 }
 0x39a   :  { %3784 = vmatpush3.bf16.msra.mxu0 %v4420_v38 }
 0x39b   :  { %3785 = vmatprep.subr.bf16.mxu0 %v4421_v11 }
 0x39e   :  { %3786 = vmatpush3.bf16.msra.mxu0 %v4422_v59 }
 0x39f   :  { %3787 = vmatprep.subr.bf16.mxu0 %v4423_v7 }
 0x3a2   :  { %3788 = vmatpush3.bf16.msra.mxu0 %v4424_v60 }
 0x3a3   :  { %3789 = vmatprep.subr.bf16.mxu0 %v4425_v61 }
 0x3a6   :  { %3790 = vmatpush3.bf16.msra.mxu0 %v4426_v62 }
 0x3a7   :  { %3791 = vmatprep.subr.bf16.mxu0 %v4427_v63 }
 0x3aa   :  { %3792 = vmatpush3.bf16.msra.mxu0 %v4428_v8 }
 0x426   :  { %v2837_v33 = vpop.f32.mrb[4].mxu1 }
 0x427   :  { %v3899_v36 = vadd.f32 %v2837_v33, %v1608_v9  ;;  %v2839_v12 = vpop.f32.mrb[5].mxu1 }
 0x428   :  { %v3900_v13 = vadd.f32 %v2839_v12, %v1612_v10  ;;  %v2841_v15 = vpop.f32.mrb[6].mxu1 }
 0x429   :  { %v2842_v2 = vpop.f32.mrb[7].mxu1  ;;  %v2846_v17 = vpack.c.bf16 %v3899_v36, %v3899_v36 }
 0x42a   :  { %v2847_v16 = vpack.c.bf16 %v3900_v13, %v3900_v13 }
 0x42c   :  { %3346 = vmatprep.mubr.bf16.mxu0 %v2847_v16 }
 0x42d   :  { %3347 = vmatmul.mubr.bf16.vlgmr.msra.gmra.mrb[20].mxu0 %v2846_v17 }
 0x440   :  { %v3749_v18 = vpop.f32.mrb[12].mxu0 }
 0x441   :  { %v3750_v19 = vpop.f32.mrb[13].mxu0 }
 0x442   :  { %v3751_v20 = vadd.f32 %v3750_v19, %v3749_v18  ;;  %v3752_v23 = vpop.f32.mrb[14].mxu0 }
 0x443   :  { %v3753_v25 = vpop.f32.mrb[15].mxu0 }
 0x460   :  { %v3771_v26 = vpop.f32.mrb[16].mxu0 }
 0x461   :  { %v3772_v3 = vpop.f32.mrb[17].mxu0 }
 0x462   :  { %v3773_v27 = vadd.f32 %v3772_v3, %v3771_v26  ;;  %v3774_v28 = vpop.f32.mrb[18].mxu0 }
 0x463   :  { %v3775_v5 = vpop.f32.mrb[19].mxu0 }
 0x464   :  { %v3309_v21 = vadd.f32 %v3773_v27, %v3751_v20 }
 0x500   :  { %v3793_v24 = vpop.f32.mrb[20].mxu0 }
 0x501   :  { %v3794_v22 = vpop.f32.mrb[21].mxu0 }
 0x502   :  { %v3795_v29 = vadd.f32 %v3794_v22, %v3793_v24  ;;  %v3796_v30 = vpop.f32.mrb[22].mxu0 }
 0x503   :  { %v3797_v31 = vpop.f32.mrb[23].mxu0 }
 0x504   :  { %v3349_v14 = vadd.f32 %v3795_v29, %v3309_v21 }
 0x506   :  { %v3361_v34 = vadd.f32 %v3732_v32, %v3349_v14 }
 0x508   :  { %3362 = vst [vmem:[#allocation16] sm:$0xff] %v3361_v34 }
 0x509   :  { %4618 = shalt.err (!%p4615_p12)
}
 0x50a   :  { %s4619_s0 = scalar_lea.hbm %s4989_s11, 128 }
 0x50b   :  { %p4620_p13 = scmp.ne.s32.totalorder %s4989_s11, %s4619_s0  ;;  %p4623_p0 = scmp.lt.u32.totalorder %s4619_s0, %s4989_s11 }
 0x50d   :  { %p4625_p1 = pnand %p4623_p0, %p4620_p13 }
 0x50f   :  { %4628 = shalt.err (!%p4625_p1)
}
 0x510   :  { %3372 = dma.vmem_to_hbm [thread:$0]  %s3370_s3, 128, %s4989_s11, [#allocation4]  }
 0x511   :  { %4639 = dma.done.wait [#allocation4], 128  }
 0x512   :  { %4640 = vsyncadd [#allocation4], 4294967168 }
 0x513   :  { %3376 = vsyncpa [#allocation3], 1 }
 0x514   :  { %3377 = vsyncpa [#allocation6], 1 }
 0x515   :  { %3378 = vsyncpa [#allocation9], 1 }
 0x516   :  { %3379 = vsyncpa [#allocation12], 1 }
 0x517   :  { %3380 = vsyncpa [#allocation15], 1 }
 0x518   :  { %3381 = vsyncpa [#allocation4], 1 }

</bundles_post_ra>
